<compile_context>
chip_gen: v5e
topology: v5e:2x2
jax: 0.10.0
libtpu: 0.0.40
codegen_flags: <defaults>
</compile_context>

<pallas_src>
import functools

import jax
import jax.numpy as jnp
from jax.experimental import pallas as pl
from jax.experimental.pallas import tpu as pltpu


def _similarity_loss_kernel(x_ref, y_ref, o_ref, *, scale: float):
    """Processes one (TB, D) batch tile and accumulates sum of cosines."""

    @pl.when(pl.program_id(0) == 0)
    def _init():
        o_ref[...] = jnp.zeros_like(o_ref)

    x = x_ref[...].astype(jnp.float32)
    y = y_ref[...].astype(jnp.float32)

    # Row-wise dot product and squared L2 norms (lane-axis reductions -> XLU).
    dot = jnp.sum(x * y, axis=1, keepdims=True)           # [TB, 1]
    nx = jnp.sqrt(jnp.sum(x * x, axis=1, keepdims=True))  # [TB, 1]
    ny = jnp.sqrt(jnp.sum(y * y, axis=1, keepdims=True))  # [TB, 1]

    eps = jnp.float32(1e-12)  # matches torch.nn.functional.normalize default
    cos = dot / (jnp.maximum(nx, eps) * jnp.maximum(ny, eps))  # [TB, 1]
    # Zero-padded batch rows have dot == 0 and eps-clamped norms -> cos == 0,
    # so padding never biases the accumulated sum.

    o_ref[...] += jnp.sum(cos, keepdims=True)              # (1, 1) accumulator

    @pl.when(pl.program_id(0) == pl.num_programs(0) - 1)
    def _finalize():
        # loss = 2 - (2 / B_true) * sum_i cos_i
        o_ref[...] = 2.0 - scale * o_ref[...]


def _round_up(n: int, m: int) -> int:
    return ((n + m - 1) // m) * m


def _pick_batch_tile(batch: int, feat: int, itemsize: int) -> int:
    # 2 inputs x 2 pipeline buffers x (tb x feat x itemsize) must stay well
    # under the scoped VMEM limit (32 MiB default; only 64 MiB physical VMEM
    # on v7x), so budget ~8 MiB for the double-buffered input tiles.
    budget_bytes = 8 * 1024 * 1024
    per_row = 2 * 2 * feat * itemsize
    tb = max(8, (budget_bytes // max(per_row, 1)) // 8 * 8)
    tb = min(tb, 512)                    # diminishing returns past ~512 rows
    tb = min(tb, _round_up(batch, 8))    # never bigger than the (padded) batch
    return int(tb)


def similarity_loss(x: jax.Array, y: jax.Array, *, tb: int | None = None) -> jax.Array:
    assert x.shape == y.shape and x.ndim == 2, "expected matching 2D [B, D] inputs"
    B, D = x.shape

    if tb is None:
        tb = _pick_batch_tile(B, D, jnp.dtype(x.dtype).itemsize)
    assert tb % 8 == 0, "batch tile must be a multiple of 8 sublanes"

    b_pad = _round_up(B, tb)
    if b_pad != B:
        # Zero rows contribute nothing to the cosine sum (see kernel comment).
        x = jnp.pad(x, ((0, b_pad - B), (0, 0)))
        y = jnp.pad(y, ((0, b_pad - B), (0, 0)))

    grid = (b_pad // tb,)
    kernel = functools.partial(_similarity_loss_kernel, scale=2.0 / float(B))

    out = pl.pallas_call(
        kernel,
        out_shape=jax.ShapeDtypeStruct((1, 1), jnp.float32),
        grid=grid,
        in_specs=[
            pl.BlockSpec((tb, D), lambda i: (i, 0)),   # keep full D on lanes
            pl.BlockSpec((tb, D), lambda i: (i, 0)),
        ],
        out_specs=pl.BlockSpec((1, 1), lambda i: (0, 0)),  # resident accumulator
        compiler_params=pltpu.CompilerParams(
            # output is accumulated across the batch-tile axis -> not parallel
            dimension_semantics=("arbitrary",),
        ),
    )(x, y)
    return out[0, 0]


def _reference(x, y):
    xn = x / jnp.maximum(jnp.sqrt(jnp.sum(x * x, axis=1, keepdims=True)), 1e-12)
    yn = y / jnp.maximum(jnp.sqrt(jnp.sum(y * y, axis=1, keepdims=True)), 1e-12)
    return jnp.mean(2.0 - 2.0 * jnp.sum(xn * yn, axis=-1))


if __name__ == "__main__":
    key = jax.random.PRNGKey(0)
    k1, k2, k3, k4 = jax.random.split(key, 4)

    # Case 1: multi-tile grid with batch padding (B not a multiple of the tile).
    B, D = 500, 256
    x = jax.random.normal(k1, (B, D), dtype=jnp.float32)
    y = jax.random.normal(k2, (B, D), dtype=jnp.float32)
    loss = jax.block_until_ready(similarity_loss(x, y, tb=128))
    ref = _reference(x, y)
    assert jnp.allclose(loss, ref, atol=1e-5, rtol=1e-5), (loss, ref)

    # Case 2: tiny single-tile case, feature dim narrower than one lane tile.
    B2, D2 = 8, 32
    x2 = jax.random.normal(k3, (B2, D2), dtype=jnp.float32)
    y2 = jax.random.normal(k4, (B2, D2), dtype=jnp.float32)
    loss2 = jax.block_until_ready(similarity_loss(x2, y2))
    ref2 = _reference(x2, y2)
    assert jnp.allclose(loss2, ref2, atol=1e-5, rtol=1e-5), (loss2, ref2)

    print("KERNEL_OK")
</pallas_src>

<mosaic_0001>
module attributes {stable_mosaic.version = 11 : i64} {
  func.func @_similarity_loss_kernel(%arg0: i32, %arg1: memref<128x256xf32, #tpu.memory_space<vmem>>, %arg2: memref<128x256xf32, #tpu.memory_space<vmem>>, %arg3: memref<1x1xf32, #tpu.memory_space<vmem>>) attributes {dimension_semantics = [#tpu.dimension_semantics<arbitrary>], iteration_bounds = array<i64: 4>, scalar_prefetch = 0 : i64, scratch_operands = 0 : i64, tpu.core_type = #tpu.core_type<tc>, window_params = [{transform_indices = @transform_0, window_bounds = array<i64: 128, 256>}, {transform_indices = @transform_1, window_bounds = array<i64: 128, 256>}, {pipeline_mode = #tpu.pipeline_mode<synchronous>, transform_indices = @transform_2, window_bounds = array<i64: 1, 1>}]} {
    %c0_i32 = arith.constant 0 : i32
    %0 = arith.cmpi eq, %arg0, %c0_i32 : i32
    %1 = arith.extui %0 : i1 to i32
    %c0_i32_0 = arith.constant 0 : i32
    %2 = arith.cmpi ne, %1, %c0_i32_0 : i32
    scf.if %2 {
      %cst_14 = arith.constant 0.000000e+00 : f32
      %33 = vector.broadcast %cst_14 : f32 to vector<1x1xf32>
      %c0_15 = arith.constant 0 : index
      %c0_16 = arith.constant 0 : index
      %34 = vector.load %arg3[%c0_15, %c0_16] : memref<1x1xf32, #tpu.memory_space<vmem>>, vector<1x1xf32>
      tpu.vector_store %arg3[%c0_15, %c0_16], %33 {strides = array<i32>} : memref<1x1xf32, #tpu.memory_space<vmem>>, vector<1x1xf32>,
    } else {
    }
    %c0 = arith.constant 0 : index
    %c0_1 = arith.constant 0 : index
    %3 = vector.load %arg1[%c0, %c0_1] : memref<128x256xf32, #tpu.memory_space<vmem>>, vector<128x256xf32>
    %c0_2 = arith.constant 0 : index
    %c0_3 = arith.constant 0 : index
    %4 = vector.load %arg2[%c0_2, %c0_3] : memref<128x256xf32, #tpu.memory_space<vmem>>, vector<128x256xf32>
    %5 = arith.mulf %3, %4 : vector<128x256xf32>
    %cst = arith.constant dense<0.000000e+00> : vector<128xf32>
    %6 = vector.multi_reduction <add>, %5, %cst [1] : vector<128x256xf32> to vector<128xf32>
    %7 = vector.shape_cast %6 : vector<128xf32> to vector<128x1xf32>
    %8 = arith.mulf %3, %3 : vector<128x256xf32>
    %cst_4 = arith.constant dense<0.000000e+00> : vector<128xf32>
    %9 = vector.multi_reduction <add>, %8, %cst_4 [1] : vector<128x256xf32> to vector<128xf32>
    %10 = vector.shape_cast %9 : vector<128xf32> to vector<128x1xf32>
    %11 = math.sqrt %10 : vector<128x1xf32>
    %12 = arith.mulf %4, %4 : vector<128x256xf32>
    %cst_5 = arith.constant dense<0.000000e+00> : vector<128xf32>
    %13 = vector.multi_reduction <add>, %12, %cst_5 [1] : vector<128x256xf32> to vector<128xf32>
    %14 = vector.shape_cast %13 : vector<128xf32> to vector<128x1xf32>
    %15 = math.sqrt %14 : vector<128x1xf32>
    %cst_6 = arith.constant 9.99999996E-13 : f32
    %16 = vector.broadcast %cst_6 : f32 to vector<128x1xf32>
    %17 = arith.maximumf %11, %16 : vector<128x1xf32>
    %cst_7 = arith.constant 9.99999996E-13 : f32
    %18 = vector.broadcast %cst_7 : f32 to vector<128x1xf32>
    %19 = arith.maximumf %15, %18 : vector<128x1xf32>
    %20 = arith.mulf %17, %19 : vector<128x1xf32>
    %21 = arith.divf %7, %20 : vector<128x1xf32>
    %c0_8 = arith.constant 0 : index
    %c0_9 = arith.constant 0 : index
    %22 = vector.load %arg3[%c0_8, %c0_9] : memref<1x1xf32, #tpu.memory_space<vmem>>, vector<1x1xf32>
    %23 = vector.shape_cast %21 : vector<128x1xf32> to vector<1x128x1xf32>
    %cst_10 = arith.constant dense<0.000000e+00> : vector<1xf32>
    %24 = vector.multi_reduction <add>, %23, %cst_10 [1, 2] : vector<1x128x1xf32> to vector<1xf32>
    %25 = vector.shape_cast %24 : vector<1xf32> to vector<1x1x1xf32>
    %26 = vector.extract %25[0, 0, 0] : f32 from vector<1x1x1xf32>
    %27 = vector.broadcast %26 : f32 to vector<1x1xf32>
    %28 = arith.addf %22, %27 : vector<1x1xf32>
    %c0_11 = arith.constant 0 : index
    %c0_12 = arith.constant 0 : index
    %29 = vector.load %arg3[%c0_11, %c0_12] : memref<1x1xf32, #tpu.memory_space<vmem>>, vector<1x1xf32>
    tpu.vector_store %arg3[%c0_11, %c0_12], %28 {strides = array<i32>} : memref<1x1xf32, #tpu.memory_space<vmem>>, vector<1x1xf32>,
    %c3_i32 = arith.constant 3 : i32
    %30 = arith.cmpi eq, %arg0, %c3_i32 : i32
    %31 = arith.extui %30 : i1 to i32
    %c0_i32_13 = arith.constant 0 : i32
    %32 = arith.cmpi ne, %31, %c0_i32_13 : i32
    scf.if %32 {
      %c0_14 = arith.constant 0 : index
      %c0_15 = arith.constant 0 : index
      %33 = vector.load %arg3[%c0_14, %c0_15] : memref<1x1xf32, #tpu.memory_space<vmem>>, vector<1x1xf32>
      %cst_16 = arith.constant 4.000000e-03 : f32
      %34 = vector.broadcast %cst_16 : f32 to vector<1x1xf32>
      %35 = arith.mulf %34, %33 : vector<1x1xf32>
      %cst_17 = arith.constant 2.000000e+00 : f32
      %36 = vector.broadcast %cst_17 : f32 to vector<1x1xf32>
      %37 = arith.subf %36, %35 : vector<1x1xf32>
      %c0_18 = arith.constant 0 : index
      %c0_19 = arith.constant 0 : index
      %38 = vector.load %arg3[%c0_18, %c0_19] : memref<1x1xf32, #tpu.memory_space<vmem>>, vector<1x1xf32>
      tpu.vector_store %arg3[%c0_18, %c0_19], %37 {strides = array<i32>} : memref<1x1xf32, #tpu.memory_space<vmem>>, vector<1x1xf32>,
    } else {
    }
    return
  }
  func.func @transform_0(%arg0: i32) -> (i32, i32) {
    %c0_i32 = arith.constant 0 : i32
    %c0_i32_0 = arith.constant 0 : i32
    return %arg0, %c0_i32 : i32, i32
  }
  func.func @transform_1(%arg0: i32) -> (i32, i32) {
    %c0_i32 = arith.constant 0 : i32
    %c0_i32_0 = arith.constant 0 : i32
    return %arg0, %c0_i32 : i32, i32
  }
  func.func @transform_2(%arg0: i32) -> (i32, i32) {
    %c0_i32 = arith.constant 0 : i32
    %c0_i32_0 = arith.constant 0 : i32
    %c0_i32_1 = arith.constant 0 : i32
    return %c0_i32, %c0_i32_0 : i32, i32
  }
}

</mosaic_0001>

<bundles_post_ra>
// kernel: tpu_custom_call.1
= control target key start
LH: loop header
LB: loop body
LE: loop exit
PB: predicated region body
PF: predicated region fallthrough
CT: control target
= control target key end

     0   :  { %7 = vsyncpa [#allocation3], 0  ;;  %s3212_s0 = inlined_call_operand.hbm [shape: f32[512,256], index: 0, kind: input, shape index: {}]   ;;  %s3213_s1 = inlined_call_operand.hbm [shape: f32[512,256], index: 1, kind: input, shape index: {}]   ;;  %s3214_s2 = inlined_call_operand.hbm [shape: f32[1,1], index: 2, kind: output, shape index: {}]  }
   0x1   :  { %9 = vsyncpa [#allocation3 + $0x1], 0 }
   0x2   :  { %10 = vsyncpa [#allocation6], 0 }
   0x3   :  { %12 = vsyncpa [#allocation6 + $0x1], 0 }
   0x4   :  { %13 = vsyncpa [#allocation4], 0  ;;  %s1643_s9 = smov 0   ;;  %s1645_s10 = smov 0  }
   0x5   :  { %s1647_s11 = smov 0   ;;  %s1649_s12 = smov 0  }
   0x6 LB: > { %s1662_s13 = sadd.s32 4294967295, %s1622_s12   ;;  %s1665_s14 = sadd.s32 1, %s1622_s12   ;;  %s1622_s12 = sphi %s1649_s12, %s3277_s12   ;;  %s1618_s11 = sphi %s1647_s11, %s3276_s11   ;;  %s1614_s10 = sphi %s1645_s10, %s3275_s10   ;;  %s1610_s9 = sphi %s1643_s9, %s3274_s9  }
   0x7   : > { %s23_s15 = ssub.s32 %s1622_s12, %s1665_s14  ;;  %s26_s16 = sadd.s32 1, %s1618_s11 }
   0x8   : > { %p24_p0 = scmp.eq.s32.totalorder %s23_s15, 0  ;;  %p33_p1 = scmp.ne.s32.totalorder %s1618_s11, %s1614_s10 }
   0x9   : > { %p34_p2 = scmp.eq.s32.totalorder %s1622_s12, 0  ;;  %p39_p3 = scmp.ne.s32.totalorder %s1614_s10, %s1610_s9 }
   0xa   : > { %s1675_s17 = scalar_select %p24_p0, %s1618_s11, %s26_s16  }
   0xb   : > { %p1677_p4 = por %p34_p2, %p33_p1  ;;  %p40_p5 = scmp.eq.s32.totalorder %s1662_s13, 0 }
   0xc   : > { %p1357_p6 = scmp.lt.s32.totalorder %s1622_s12, 4  ;;  %s1688_s20 = sand.u32 1, %s1618_s11  }
   0xd   : > { %p1683_p7 = por %p40_p5, %p39_p3  ;;  %s1319_s21 = sshll.u32 %s1688_s20, 8 }
   0xe   : > { %s1337_s22 = sshll.u32 %s1622_s12, 8  ;;  %s114_s26 = scalar_lea.vmem [#allocation2], %s1319_s21 }
   0xf   : > { %s120_s25 = scalar_lea.hbm %s3212_s0, %s1337_s22  ;;  %s123_s27 = sshll.u32 %s114_s26, 4  ;;  %s124_s27 = int_to_ptr.vmem [resolvable:$true] %s123_s27 }
  0x10   : > { %s121_s28 = sshll.u32 %s120_s25, 4  ;;  %p1701_p8 = pnand %p1357_p6, %p1677_p4  ;;  %s122_s28 = int_to_ptr.hbm [resolvable:$true] %s121_s28 }
  0x11   : > { %p1327_p9 = scmp.ge.s32.totalorder %s1622_s12, 1  ;;  %s111_s30 = scalar_lea.sflag [#allocation3], %s1688_s20 }
  0x12   : > { %s1492_s3 = sshra.s32 %s122_s28, 4  ;;  %p1496_p11 = pneg %p1701_p8  ;;  %s1493_s3 = int_to_ptr.hbm [resolvable:$true] %s1492_s3 }
  0x13   : > { %s1494_s4 = scalar_lea.hbm %s1493_s3, 256  ;;  %s1499_s7 = scalar_lea.hbm %s3212_s0, 1024 }
  0x14   : > { %p1495_p10 = scmp.ne.s32.totalorder %s1493_s3, %s1494_s4  ;;  %p1500_p0 = scmp.lt.s32.totalorder %s1493_s3, %s3212_s0 }
  0x15   : > { %p1501_p1 = scmp.lt.s32.totalorder %s1499_s7, %s1494_s4 }
  0x16   : > { %p1497_p12 = pnand %p1496_p11, %p1495_p10 }
  0x17   : > { %p1502_p2 = por %p1501_p1, %p1500_p0 }
  0x18   : > { %p1498_p13 = pneg %p1497_p12 }
  0x1a   : > { %p1503_p3 = pnand %p1502_p2, %p1498_p13 }
  0x1c   : > { %1506 = shalt.err (!%p1503_p3)
}
  0x1d   : > { %s1624_s15 = smov 256   ;;  %s1625_s16 = smov 16  }
  0x1e   : > { %1353 = dma.hbm_to_vmem [thread:$0]  (!%p1701_p8), %s122_s28, 4096, %s124_s27, %s111_s30, %s1624_s15, %s1624_s15, %s1625_s16  }
  0x1f   : > { %p154_p4 = scmp.lt.s32.totalorder %s1622_s12, 5  ;;  %s143_s24 = scalar_lea.hbm %s3213_s1, %s1337_s22 }
  0x20   : > { %s144_s26 = sshll.u32 %s143_s24, 4  ;;  %s137_s3 = scalar_lea.vmem [#allocation5], %s1319_s21  ;;  %s145_s26 = int_to_ptr.hbm [resolvable:$true] %s144_s26 }
  0x21   : > { %p1728_p5 = pnand %p1327_p9, %p154_p4  ;;  %s146_s4 = sshll.u32 %s137_s3, 4  ;;  %s147_s4 = int_to_ptr.vmem [resolvable:$true] %s146_s4 }
  0x22   : > { %s134_s5 = scalar_lea.sflag [#allocation6], %s1688_s20  ;;  %s1522_s6 = sshra.s32 %s145_s26, 4  ;;  %s1523_s6 = int_to_ptr.hbm [resolvable:$true] %s1522_s6 }
  0x23   : > { %s1524_s27 = scalar_lea.hbm %s1523_s6, 256  ;;  %s1529_s28 = scalar_lea.hbm %s3213_s1, 1024 }
  0x24   : > { %p1525_p6 = scmp.ne.s32.totalorder %s1523_s6, %s1524_s27  ;;  %p1530_p9 = scmp.lt.s32.totalorder %s1523_s6, %s3213_s1 }
  0x25   : > { %p1531_p13 = scmp.lt.s32.totalorder %s1529_s28, %s1524_s27 }
  0x26   : > { %p1527_p10 = pnand %p1525_p6, %p1496_p11 }
  0x27   : > { %p1532_p0 = por %p1531_p13, %p1530_p9 }
  0x28   : > { %p1528_p12 = pneg %p1527_p10 }
  0x2a   : > { %p1533_p1 = pnand %p1532_p0, %p1528_p12 }
  0x2c   : > { %1536 = shalt.err (!%p1533_p1)
}
  0x2d   : > { %1356 = dma.hbm_to_vmem [thread:$0]  (!%p1701_p8), %s145_s26, 4096, %s147_s4, %s134_s5, %s1624_s15, %s1624_s15, %s1625_s16  }
  0x2e   : > { %158 = sbr.rel (%p1728_p5) target bundleno = 568 (0x238), region = 28  ;;  %s160_s20 = sand.u32 (!%p1728_p5), 1, %s1614_s10  }
  0x2f   : > { %s1328_s21 = sshll.u32 (!%p1728_p5), %s160_s20, 8  ;;  %s161_s8 = scalar_lea.sflag (!%p1728_p5), [#allocation3], %s160_s20 }
  0x30   : > { %s1749_s9 = scalar_lea.vmem (!%p1728_p5), [#allocation2], %s1328_s21 }
  0x33   : > { %1597 = dma.done.wait (%p1683_p7), %s161_s8, 4096  }
  0x34   : > { %1599 = vsyncadd (%p1683_p7), %s161_s8, 4294963200  ;;  %s171_s18 = scalar_lea.sflag [#allocation6], %s160_s20  ;;  %s1755_s23 = scalar_lea.vmem [#allocation5], %s1328_s21 }
  0x35   : > { %1601 = dma.done.wait (%p1683_p7), %s171_s18, 4096  }
  0x36   : > { %1603 = vsyncadd (%p1683_p7), %s171_s18, 4294963200  ;;  %p1330_p8 = scmp.ne.s32.totalorder %s1662_s13, 0 }
  0x38   : > { %201 = sbr.rel (%p1330_p8) target bundleno = 63 (0x3f), region = 40 }
  0x3d   : > { %vm202_vm0 = vcmask 0   ;;  %v1626_v0 = vmov 0.0  }
  0x3e   : > { %203 = vst.msk [vmem:[#allocation7] sm:$0x1] %vm202_vm0, %v1626_v0 }
  0x3f PF: > { %v1763_v1 = vld [vmem:[%s1755_s23] sm:$0xff]  ;;  %v1766_v2 = vld [vmem:[%s1755_s23 + $0x8] sm:$0xff]  ;;  %v1793_v13 = vld [vmem:[%s1755_s23 + $0x10] sm:$0xff]  ;;  %p1331_p7 = scmp.ne.s32.totalorder %s1662_s13, 3 }
  0x40   : > { %v1769_v3 = vld [vmem:[%s1749_s9 + $0x20] sm:$0xff]  ;;  %v620_v4 = vmul.f32 %v1763_v1, %v1763_v1  ;;  %v621_v5 = vmul.f32 %v1766_v2, %v1766_v2  ;;  %v1776_v6 = vld [vmem:[%s1749_s9 + $0x28] sm:$0xff]  ;;  %v1796_v14 = vld [vmem:[%s1755_s23 + $0x18] sm:$0xff]  ;;  %v622_v22 = vmul.f32 %v1793_v13, %v1793_v13 }
  0x41   : > { %v352_v7 = vmul.f32 %v1769_v3, %v1769_v3  ;;  %v1781_v8 = vld [vmem:[%s1749_s9] sm:$0xff]  ;;  %v1784_v9 = vld [vmem:[%s1749_s9 + $0x8] sm:$0xff]  ;;  %v353_v10 = vmul.f32 %v1776_v6, %v1776_v6  ;;  %v1805_v18 = vld [vmem:[%s1749_s9 + $0x10] sm:$0xff]  ;;  %v623_v23 = vmul.f32 %v1796_v14, %v1796_v14 }
  0x42   : > { %v348_v11 = vmul.f32 %v1781_v8, %v1781_v8  ;;  %v349_v12 = vmul.f32 %v1784_v9, %v1784_v9  ;;  %v1799_v15 = vld [vmem:[%s1755_s23 + $0x20] sm:$0xff]  ;;  %v652_v16 = vadd.f32 %v621_v5, %v620_v4  ;;  %v1802_v17 = vld [vmem:[%s1755_s23 + $0x28] sm:$0xff]  ;;  %v1808_v19 = vld [vmem:[%s1749_s9 + $0x18] sm:$0xff]  ;;  %v350_v26 = vmul.f32 %v1805_v18, %v1805_v18 }
  0x43   : > { %v386_v20 = vadd.f32 %v353_v10, %v352_v7  ;;  %v624_v24 = vmul.f32 %v1799_v15, %v1799_v15  ;;  %v625_v25 = vmul.f32 %v1802_v17, %v1802_v17  ;;  %v351_v27 = vmul.f32 %v1808_v19, %v1808_v19  ;;  %v1823_v31 = vld [vmem:[%s1755_s23 + $0x30] sm:$0xff]  ;;  %v1826_v32 = vld [vmem:[%s1755_s23 + $0x38] sm:$0xff]  ;;  %v1829_v33 = vld [vmem:[%s1749_s9 + $0x40] sm:$0xff] }
  0x44   : > { %v380_v21 = vadd.f32 %v349_v12, %v348_v11  ;;  %653 = vadd.xlane.f32.xlu1 %v652_v16  ;;  %v655_v28 = vadd.f32 %v623_v23, %v622_v22  ;;  %v1832_v34 = vld [vmem:[%s1749_s9 + $0x48] sm:$0xff]  ;;  %v1835_v35 = vld [vmem:[%s1749_s9 + $0x30] sm:$0xff]  ;;  %v1838_v36 = vld [vmem:[%s1749_s9 + $0x38] sm:$0xff]  ;;  %v626_v37 = vmul.f32 %v1823_v31, %v1823_v31  ;;  %v627_v38 = vmul.f32 %v1826_v32, %v1826_v32 }
  0x45   : > { %387 = vadd.xlane.f32.xlu2 %v386_v20  ;;  %v658_v29 = vadd.f32 %v625_v25, %v624_v24  ;;  %v383_v30 = vadd.f32 %v351_v27, %v350_v26  ;;  %v356_v39 = vmul.f32 %v1829_v33, %v1829_v33  ;;  %v357_v40 = vmul.f32 %v1832_v34, %v1832_v34  ;;  %v1853_v46 = vld [vmem:[%s1749_s9 + $0x50] sm:$0xff]  ;;  %v1856_v47 = vld [vmem:[%s1749_s9 + $0x58] sm:$0xff]  ;;  %v1865_v50 = vld [vmem:[%s1755_s23 + $0x40] sm:$0xff] }
  0x46   : > { %381 = vadd.xlane.f32.xlu0 %v380_v21  ;;  %v354_v41 = vmul.f32 %v1835_v35, %v1835_v35  ;;  %v355_v42 = vmul.f32 %v1838_v36, %v1838_v36  ;;  %v661_v43 = vadd.f32 %v627_v38, %v626_v37  ;;  %v1859_v48 = vld [vmem:[%s1755_s23 + $0x50] sm:$0xff]  ;;  %v1862_v49 = vld [vmem:[%s1755_s23 + $0x58] sm:$0xff]  ;;  %v1868_v51 = vld [vmem:[%s1755_s23 + $0x48] sm:$0xff]  ;;  %v358_v52 = vmul.f32 %v1853_v46, %v1853_v46 }
  0x47   : > { %v392_v44 = vadd.f32 %v357_v40, %v356_v39  ;;  %v359_v53 = vmul.f32 %v1856_v47, %v1856_v47  ;;  %v630_v54 = vmul.f32 %v1859_v48, %v1859_v48  ;;  %v631_v55 = vmul.f32 %v1862_v49, %v1862_v49  ;;  %v1883_v61 = vld [vmem:[%s1755_s23 + $0x60] sm:$0xff]  ;;  %v1886_v62 = vld [vmem:[%s1755_s23 + $0x68] sm:$0xff]  ;;  %v1889_v63 = vld [vmem:[%s1749_s9 + $0x70] sm:$0xff] }
  0x48   : > { %v389_v45 = vadd.f32 %v355_v42, %v354_v41  ;;  %v628_v56 = vmul.f32 %v1865_v50, %v1865_v50  ;;  %v629_v57 = vmul.f32 %v1868_v51, %v1868_v51  ;;  %v1892_v0 = vld [vmem:[%s1749_s9 + $0x78] sm:$0xff]  ;;  %v1895_v4 = vld [vmem:[%s1749_s9 + $0x60] sm:$0xff]  ;;  %v1898_v5 = vld [vmem:[%s1749_s9 + $0x68] sm:$0xff]  ;;  %v632_v7 = vmul.f32 %v1883_v61, %v1883_v61 }
  0x49   : > { %v395_v58 = vadd.f32 %v359_v53, %v358_v52  ;;  %v667_v59 = vadd.f32 %v631_v55, %v630_v54  ;;  %v633_v10 = vmul.f32 %v1886_v62, %v1886_v62  ;;  %v362_v11 = vmul.f32 %v1889_v63, %v1889_v63  ;;  %v1913_v24 = vld [vmem:[%s1749_s9 + $0x80] sm:$0xff]  ;;  %v1916_v25 = vld [vmem:[%s1749_s9 + $0x88] sm:$0xff]  ;;  %v1946_v52 = vld [vmem:[%s1755_s23 + $0x98] sm:$0xff] }
  0x4a   : > { %v664_v60 = vadd.f32 %v629_v57, %v628_v56  ;;  %v363_v12 = vmul.f32 %v1892_v0, %v1892_v0  ;;  %v360_v16 = vmul.f32 %v1895_v4, %v1895_v4  ;;  %v361_v20 = vmul.f32 %v1898_v5, %v1898_v5  ;;  %v1919_v26 = vld [vmem:[%s1755_s23 + $0x80] sm:$0xff]  ;;  %v1922_v27 = vld [vmem:[%s1755_s23 + $0x88] sm:$0xff]  ;;  %v1955_v55 = vld [vmem:[%s1749_s9 + $0x90] sm:$0xff] }
  0x4b   : > { %v670_v21 = vadd.f32 %v633_v10, %v632_v7  ;;  %v365_v37 = vmul.f32 %v1916_v25, %v1916_v25  ;;  %v636_v38 = vmul.f32 %v1919_v26, %v1919_v26  ;;  %v637_v39 = vmul.f32 %v1922_v27, %v1922_v27  ;;  %v1949_v53 = vld [vmem:[%s1749_s9 + $0xa0] sm:$0xff]  ;;  %v1952_v54 = vld [vmem:[%s1749_s9 + $0xa8] sm:$0xff]  ;;  %v1958_v56 = vld [vmem:[%s1749_s9 + $0x98] sm:$0xff] }
  0x4c   : > { %656 = vadd.xlane.f32.xlu1 %v655_v28  ;;  %v401_v22 = vadd.f32 %v363_v12, %v362_v11  ;;  %v398_v23 = vadd.f32 %v361_v20, %v360_v16  ;;  %v1925_v28 = vld [vmem:[%s1755_s23 + $0x70] sm:$0xff]  ;;  %v366_v7 = vmul.f32 %v1955_v55, %v1955_v55  ;;  %v367_v10 = vmul.f32 %v1958_v56, %v1958_v56  ;;  %v1976_v16 = vld [vmem:[%s1749_s9 + $0xb8] sm:$0xff] }
  0x4d   : > { %659 = vadd.xlane.f32.xlu2 %v658_v29  ;;  %v1928_v29 = vld [vmem:[%s1755_s23 + $0x78] sm:$0xff]  ;;  %v634_v40 = vmul.f32 %v1925_v28, %v1925_v28  ;;  %v1973_v12 = vld [vmem:[%s1749_s9 + $0xb0] sm:$0xff] }
  0x4e   : > { %384 = vadd.xlane.f32.xlu0 %v383_v30  ;;  %v364_v30 = vmul.f32 %v1913_v24, %v1913_v24  ;;  %v635_v41 = vmul.f32 %v1928_v29, %v1928_v29  ;;  %v1979_v20 = vld [vmem:[%s1755_s23 + $0xb0] sm:$0xff] }
  0x50   : > { %v404_v42 = vadd.f32 %v365_v37, %v364_v30  ;;  %v1985_v30 = vld [vmem:[%s1755_s23 + $0xa0] sm:$0xff]  ;;  %v1988_v37 = vld [vmem:[%s1755_s23 + $0xa8] sm:$0xff] }
  0x54   : > { %662 = vadd.xlane.f32.xlu1 %v661_v43  ;;  %v676_v43 = vadd.f32 %v637_v39, %v636_v38  ;;  %v268_v38 = vmul.f32 %v1763_v1, %v1781_v8  ;;  %v269_v39 = vmul.f32 %v1766_v2, %v1784_v9  ;;  %v640_v2 = vmul.f32 %v1985_v30, %v1985_v30 }
  0x55   : > { %393 = vadd.xlane.f32.xlu2 %v392_v44  ;;  %v673_v44 = vadd.f32 %v635_v41, %v634_v40  ;;  %v370_v40 = vmul.f32 %v1973_v12, %v1973_v12  ;;  %v371_v41 = vmul.f32 %v1976_v16, %v1976_v16  ;;  %v641_v8 = vmul.f32 %v1988_v37, %v1988_v37 }
  0x56   : > { %390 = vadd.xlane.f32.xlu0 %v389_v45  ;;  %v1943_v45 = vld [vmem:[%s1755_s23 + $0x90] sm:$0xff]  ;;  %v272_v9 = vmul.f32 %v1799_v15, %v1769_v3  ;;  %v270_v3 = vmul.f32 %v1793_v13, %v1805_v18  ;;  %v274_v15 = vmul.f32 %v1823_v31, %v1835_v35  ;;  %v279_v35 = vmul.f32 %v1862_v49, %v1856_v47 }
  0x57   : > { %v638_v57 = vmul.f32 %v1943_v45, %v1943_v45  ;;  %v277_v47 = vmul.f32 %v1868_v51, %v1832_v34  ;;  %v281_v49 = vmul.f32 %v1886_v62, %v1898_v5  ;;  %v284_v62 = vmul.f32 %v1919_v26, %v1913_v24 }
  0x5c   : > { %396 = vadd.xlane.f32.xlu1 %v395_v58  ;;  %v639_v58 = vmul.f32 %v1946_v52, %v1946_v52 }
  0x5d   : > { %668 = vadd.xlane.f32.xlu2 %v667_v59  ;;  %v368_v59 = vmul.f32 %v1949_v53, %v1949_v53 }
  0x5e   : > { %665 = vadd.xlane.f32.xlu0 %v664_v60  ;;  %v369_v60 = vmul.f32 %v1952_v54, %v1952_v54  ;;  %v679_v11 = vadd.f32 %v639_v58, %v638_v57  ;;  %v413_v58 = vadd.f32 %v371_v41, %v370_v40 }
  0x64   : > { %671 = vadd.xlane.f32.xlu1 %v670_v21  ;;  %v410_v21 = vadd.f32 %v369_v60, %v368_v59  ;;  %v682_v60 = vadd.f32 %v641_v8, %v640_v2  ;;  %v2061_v8 = vld [vmem:[%s1749_s9 + $0xe0] sm:$0xff] }
  0x65   : > { %402 = vadd.xlane.f32.xlu2 %v401_v22  ;;  %v407_v22 = vadd.f32 %v367_v10, %v366_v7  ;;  %v2015_v7 = vld [vmem:[%s1755_s23 + $0xc0] sm:$0xff]  ;;  %v2018_v10 = vld [vmem:[%s1755_s23 + $0xc8] sm:$0xff] }
  0x66   : > { %399 = vadd.xlane.f32.xlu0 %v398_v23  ;;  %v1982_v23 = vld [vmem:[%s1755_s23 + $0xb8] sm:$0xff]  ;;  %v645_v40 = vmul.f32 %v2018_v10, %v2018_v10 }
  0x67   : > { %v643_v1 = vmul.f32 %v1982_v23, %v1982_v23 }
  0x6c   : > { %405 = vadd.xlane.f32.xlu1 %v404_v42  ;;  %v1998_v42 = vadd.f32 %v269_v39, %v268_v38  ;;  %v2024_v38 = vld [vmem:[%s1749_s9 + $0xd8] sm:$0xff]  ;;  %v644_v39 = vmul.f32 %v2015_v7, %v2015_v7 }
  0x6d   : > { %677 = vadd.xlane.f32.xlu2 %v676_v43  ;;  %v642_v43 = vmul.f32 %v1979_v20, %v1979_v20  ;;  %v375_v18 = vmul.f32 %v2024_v38, %v2024_v38 }
  0x6e   : > { %674 = vadd.xlane.f32.xlu0 %v673_v44  ;;  %v273_v44 = vmul.f32 %v1802_v17, %v1776_v6  ;;  %v271_v6 = vmul.f32 %v1796_v14, %v1808_v19  ;;  %v275_v17 = vmul.f32 %v1826_v32, %v1838_v36  ;;  %v278_v32 = vmul.f32 %v1859_v48, %v1853_v46 }
  0x6f   : > { %v685_v59 = vadd.f32 %v643_v1, %v642_v43  ;;  %v688_v43 = vadd.f32 %v645_v40, %v644_v39  ;;  %v276_v46 = vmul.f32 %v1865_v50, %v1829_v33  ;;  %v280_v48 = vmul.f32 %v1883_v61, %v1895_v4 }
  0x70   : > { %v2012_v57 = vadd.f32 %v273_v44, %v272_v9  ;;  %v2044_v41 = vadd.f32 %v271_v6, %v270_v3  ;;  %v2046_v13 = vadd.f32 %v275_v17, %v274_v15  ;;  %v315_v36 = vadd.f32 %v279_v35, %v278_v32  ;;  %v2064_v9 = vld [vmem:[%s1749_s9 + $0xe8] sm:$0xff]  ;;  %v2067_v44 = vld [vmem:[%s1755_s23 + $0xe0] sm:$0xff]  ;;  %v234_v32 = vld [vmem:[%s1749_s9 + $0xf0] sm:$0xff] }
  0x71   : > { %v376_v3 = vmul.f32 %v2061_v8, %v2061_v8  ;;  %v312_v6 = vadd.f32 %v277_v47, %v276_v46  ;;  %v318_v15 = vadd.f32 %v281_v49, %v280_v48  ;;  %v377_v33 = vmul.f32 %v2064_v9, %v2064_v9  ;;  %v235_v35 = vld [vmem:[%s1749_s9 + $0xf8] sm:$0xff] }
  0x72   : > { %v648_v34 = vmul.f32 %v2067_v44, %v2067_v44  ;;  %v285_v4 = vmul.f32 %v1922_v27, %v1916_v25  ;;  %v378_v25 = vmul.f32 %v234_v32, %v234_v32  ;;  %v379_v27 = vmul.f32 %v235_v35, %v235_v35 }
  0x73   : > { %v422_v17 = vadd.f32 %v377_v33, %v376_v3  ;;  %v288_v46 = vmul.f32 %v1985_v30, %v1949_v53  ;;  %v291_v30 = vmul.f32 %v1982_v23, %v1976_v16 }
  0x74   : > { %680 = vadd.xlane.f32.xlu1 %v679_v11  ;;  %v2021_v11 = vld [vmem:[%s1749_s9 + $0xd0] sm:$0xff]  ;;  %v324_v5 = vadd.f32 %v285_v4, %v284_v62 }
  0x75   : > { %411 = vadd.xlane.f32.xlu2 %v410_v21  ;;  %v2027_v21 = vld [vmem:[%s1749_s9 + $0xc0] sm:$0xff]  ;;  %v374_v14 = vmul.f32 %v2021_v11, %v2021_v11 }
  0x76   : > { %408 = vadd.xlane.f32.xlu0 %v407_v22  ;;  %v2030_v22 = vld [vmem:[%s1749_s9 + $0xc8] sm:$0xff]  ;;  %v372_v19 = vmul.f32 %v2027_v21, %v2027_v21 }
  0x77   : > { %v373_v31 = vmul.f32 %v2030_v22, %v2030_v22  ;;  %v419_v1 = vadd.f32 %v375_v18, %v374_v14  ;;  %v266_v14 = vld [vmem:[%s1755_s23 + $0xf0] sm:$0xff]  ;;  %v267_v18 = vld [vmem:[%s1755_s23 + $0xf8] sm:$0xff] }
  0x78   : > { %v650_v24 = vmul.f32 %v266_v14, %v266_v14  ;;  %v651_v26 = vmul.f32 %v267_v18, %v267_v18  ;;  %v299_v23 = vmul.f32 %v267_v18, %v235_v35 }
  0x79   : > { %v416_v2 = vadd.f32 %v373_v31, %v372_v19  ;;  %v282_v19 = vmul.f32 %v1925_v28, %v1889_v63  ;;  %v283_v31 = vmul.f32 %v1928_v29, %v1892_v0  ;;  %v289_v63 = vmul.f32 %v1988_v37, %v1952_v54 }
  0x7a   : > { %v286_v0 = vmul.f32 %v1943_v45, %v1955_v55  ;;  %v287_v29 = vmul.f32 %v1946_v52, %v1958_v56  ;;  %v290_v54 = vmul.f32 %v1979_v20, %v1973_v12  ;;  %v292_v37 = vmul.f32 %v2015_v7, %v2027_v21 }
  0x7b   : > { %v330_v28 = vadd.f32 %v289_v63, %v288_v46  ;;  %v296_v52 = vmul.f32 %v2067_v44, %v2061_v8  ;;  %v298_v20 = vmul.f32 %v266_v14, %v234_v32 }
  0x7c   : > { %414 = vadd.xlane.f32.xlu1 %v413_v58  ;;  %v2070_v58 = vld [vmem:[%s1755_s23 + $0xe8] sm:$0xff]  ;;  %v327_v53 = vadd.f32 %v287_v29, %v286_v0  ;;  %v333_v45 = vadd.f32 %v291_v30, %v290_v54 }
  0x7d   : > { %686 = vadd.xlane.f32.xlu2 %v685_v59  ;;  %v2073_v59 = vld [vmem:[%s1755_s23 + $0xd0] sm:$0xff]  ;;  %v649_v50 = vmul.f32 %v2070_v58, %v2070_v58  ;;  %v297_v56 = vmul.f32 %v2070_v58, %v2064_v9 }
  0x7e   : > { %683 = vadd.xlane.f32.xlu0 %v682_v60  ;;  %v2084_v60 = vld [vmem:[%s1755_s23 + $0xd8] sm:$0xff]  ;;  %v646_v51 = vmul.f32 %v2073_v59, %v2073_v59  ;;  %v294_v12 = vmul.f32 %v2073_v59, %v2021_v11 }
  0x7f   : > { %v647_v61 = vmul.f32 %v2084_v60, %v2084_v60  ;;  %v694_v39 = vadd.f32 %v649_v50, %v648_v34  ;;  %v295_v16 = vmul.f32 %v2084_v60, %v2024_v38  ;;  %v342_v21 = vadd.f32 %v297_v56, %v296_v52 }
  0x81   : > { %v691_v40 = vadd.f32 %v647_v61, %v646_v51 }
  0x84   : > { %689 = vadd.xlane.f32.xlu1 %v688_v43  ;;  %v321_v43 = vadd.f32 %v283_v31, %v282_v19 }
  0x85   : > { %420 = vadd.xlane.f32.xlu2 %v419_v1  ;;  %v697_v1 = vadd.f32 %v651_v26, %v650_v24 }
  0x86   : > { %417 = vadd.xlane.f32.xlu0 %v416_v2  ;;  %v425_v2 = vadd.f32 %v379_v27, %v378_v25 }
  0x8c   : > { %423 = vadd.xlane.f32.xlu1 %v422_v17 }
  0x8d   : > { %695 = vadd.xlane.f32.xlu2 %v694_v39 }
  0x8e   : > { %692 = vadd.xlane.f32.xlu0 %v691_v40 }
  0x94   : > { %698 = vadd.xlane.f32.xlu1 %v697_v1 }
  0x95   : > { %301 = vadd.xlane.f32.xlu2 %v1998_v42  ;;  %v293_v42 = vmul.f32 %v2018_v10, %v2030_v22  ;;  %v339_v22 = vadd.f32 %v295_v16, %v294_v12 }
  0x96   : > { %426 = vadd.xlane.f32.xlu0 %v425_v2 }
  0x97   : > { %v336_v55 = vadd.f32 %v293_v42, %v292_v37 }
  0x9c   : > { %307 = vadd.xlane.f32.xlu1 %v2012_v57 }
  0x9d   : > { %310 = vadd.xlane.f32.xlu2 %v2046_v13 }
  0x9e   : > { %304 = vadd.xlane.f32.xlu0 %v2044_v41  ;;  %v345_v41 = vadd.f32 %v299_v23, %v298_v20 }
  0xa4   : > { %316 = vadd.xlane.f32.xlu1 %v315_v36 }
  0xa5   : > { %319 = vadd.xlane.f32.xlu2 %v318_v15 }
  0xa6   : > { %313 = vadd.xlane.f32.xlu0 %v312_v6 }
  0xac   : > { %325 = vadd.xlane.f32.xlu1 %v324_v5 }
  0xad   : > { %328 = vadd.xlane.f32.xlu2 %v327_v53 }
  0xae   : > { %322 = vadd.xlane.f32.xlu0 %v321_v43 }
  0xb4   : > { %334 = vadd.xlane.f32.xlu1 %v333_v45 }
  0xb5   : > { %337 = vadd.xlane.f32.xlu2 %v336_v55 }
  0xb6   : > { %331 = vadd.xlane.f32.xlu0 %v330_v28 }
  0xb7   : > { %v2138_v57 = vpop.xlane.xlu1 %653 }
  0xb8   : > { %v2140_v7 = vpop.xlane.xlu2 %387  ;;  %1396 = vrsqrt.f32 %v2138_v57  ;;  %vm707_vm1 = vcmp.eq.f32.partialorder %v2138_v57, inf  ;;  %vm709_vm2 = vcmp.eq.f32.partialorder %v2138_v57, 0.0  ;;  %v710_v28 = vand.u32 2147483648, %v2138_v57 }
  0xb9   : > { %v2142_v10 = vpop.xlane.xlu0 %381  ;;  %1398 = vrsqrt.f32 %v2140_v7  ;;  %vm459_vm3 = vcmp.eq.f32.partialorder %v2140_v7, inf  ;;  %v462_v56 = vand.u32 2147483648, %v2140_v7  ;;  %vm461_vm5 = vcmp.eq.f32.partialorder %v2140_v7, 0.0 }
  0xba   : > { %1400 = vrsqrt.f32 %v2142_v10  ;;  %vm435_vm4 = vcmp.eq.f32.partialorder %v2142_v10, inf  ;;  %vm437_vm6 = vcmp.eq.f32.partialorder %v2142_v10, 0.0  ;;  %v438_v20 = vand.u32 2147483648, %v2142_v10 }
  0xbc   : > { %343 = vadd.xlane.f32.xlu1 %v342_v21 }
  0xbd   : > { %346 = vadd.xlane.f32.xlu2 %v345_v41 }
  0xbe   : > { %340 = vadd.xlane.f32.xlu0 %v339_v22  ;;  %v1397_v36 = vpop.eup %1396 }
  0xbf   : > { %v2146_v11 = vpop.xlane.xlu1 %656  ;;  %v1399_v8 = vpop.eup %1398  ;;  %v701_v9 = vmul.f32 %v1397_v36, %v2138_v57 }
  0xc0   : > { %v2149_v38 = vpop.xlane.xlu2 %659  ;;  %1402 = vrsqrt.f32 %v2146_v11  ;;  %v1401_v44 = vpop.eup %1400  ;;  %v453_v59 = vmul.f32 %v1399_v8, %v2140_v7  ;;  %vm719_vm7 = vcmp.eq.f32.partialorder %v2146_v11, inf  ;;  %vm721_vm10 = vcmp.eq.f32.partialorder %v2146_v11, 0.0 }
  0xc1   : > { %v2151_v13 = vpop.xlane.xlu0 %384  ;;  %1404 = vrsqrt.f32 %v2149_v38  ;;  %v702_v60 = vmul.f32 %v1397_v36, %v701_v9  ;;  %v429_v3 = vmul.f32 %v1401_v44, %v2142_v10  ;;  %vm731_vm8 = vcmp.eq.f32.partialorder %v2149_v38, inf }
  0xc2   : > { %1406 = vrsqrt.f32 %v2151_v13  ;;  %v454_v33 = vmul.f32 %v1399_v8, %v453_v59  ;;  %vm447_vm9 = vcmp.eq.f32.partialorder %v2151_v13, inf  ;;  %vm733_vm11 = vcmp.eq.f32.partialorder %v2149_v38, 0.0 }
  0xc3   : > { %v703_v34 = vmul.f32 0.5, %v702_v60  ;;  %v430_v50 = vmul.f32 %v1401_v44, %v429_v3  ;;  %vm449_vm12 = vcmp.eq.f32.partialorder %v2151_v13, 0.0 }
  0xc4   : > { %v455_v40 = vmul.f32 0.5, %v454_v33 }
  0xc5   : > { %v704_v39 = vsub.f32 1.5, %v703_v34  ;;  %v431_v14 = vmul.f32 0.5, %v430_v50  ;;  %v734_v50 = vand.u32 2147483648, %v2149_v38 }
  0xc6   : > { %v2164_v49 = vpop.eup %1402  ;;  %v456_v24 = vsub.f32 1.5, %v455_v40 }
  0xc7   : > { %v2157_v58 = vpop.xlane.xlu1 %662  ;;  %v2167_v6 = vpop.eup %1404  ;;  %v713_v51 = vmul.f32 %v2164_v49, %v2146_v11  ;;  %v705_v43 = vmul.f32 %v1397_v36, %v704_v39  ;;  %v432_v26 = vsub.f32 1.5, %v431_v14 }
  0xc8   : > { %v2160_v47 = vpop.xlane.xlu2 %393  ;;  %v2169_v15 = vpop.eup %1406  ;;  %1408 = vrsqrt.f32 %v2157_v58  ;;  %v725_v61 = vmul.f32 %v2167_v6, %v2149_v38  ;;  %v457_v53 = vmul.f32 %v1399_v8, %v456_v24  ;;  %v722_v8 = vand.u32 2147483648, %v2146_v11 }
  0xc9   : > { %v2162_v48 = vpop.xlane.xlu0 %390  ;;  %v441_v62 = vmul.f32 %v2169_v15, %v2151_v13  ;;  %1410 = vrsqrt.f32 %v2160_v47  ;;  %v714_v18 = vmul.f32 %v2164_v49, %v713_v51  ;;  %v706_v29 = vmul.f32 %v705_v43, %v2138_v57 }
  0xca   : > { %v726_v19 = vmul.f32 %v2167_v6, %v725_v61  ;;  %1412 = vrsqrt.f32 %v2162_v48  ;;  %v433_v54 = vmul.f32 %v1401_v44, %v432_v26  ;;  %v458_v41 = vmul.f32 %v457_v53, %v2140_v7 }
  0xcb   : > { %v442_v31 = vmul.f32 %v2169_v15, %v441_v62  ;;  %v715_v25 = vmul.f32 0.5, %v714_v18  ;;  %v708_v22 = vsel %vm707_vm1, %v2138_v57, %v706_v29  ;;  %v450_v24 = vand.u32 2147483648, %v2151_v13 }
  0xcc   : > { %v727_v27 = vmul.f32 0.5, %v726_v19  ;;  %v434_v36 = vmul.f32 %v433_v54, %v2142_v10  ;;  %v2252_v51 = vsel %vm709_vm2, %v710_v28, %v708_v22  ;;  %v460_v61 = vsel %vm459_vm3, %v2140_v7, %v458_v41 }
  0xcd   : > { %v443_v1 = vmul.f32 0.5, %v442_v31  ;;  %v716_v30 = vsub.f32 1.5, %v715_v25  ;;  %v746_v26 = vand.u32 2147483648, %v2157_v58  ;;  %v908_v54 = vmax.f32 %v2252_v51, 1e-12 }
  0xce   : > { %v2188_v32 = vpop.eup %1408  ;;  %v728_v37 = vsub.f32 1.5, %v727_v27  ;;  %v436_v62 = vsel %vm435_vm4, %v2142_v10, %v434_v36  ;;  %vm743_vm13 = vcmp.eq.f32.partialorder %v2157_v58, inf  ;;  %vm745_vm14 = vcmp.eq.f32.partialorder %v2157_v58, 0.0 }
  0xcf   : > { %v2179_v4 = vpop.xlane.xlu1 %396  ;;  %v2191_v35 = vpop.eup %1410  ;;  %v737_v2 = vmul.f32 %v2188_v32, %v2157_v58  ;;  %v444_v42 = vsub.f32 1.5, %v443_v1  ;;  %v717_v9 = vmul.f32 %v2164_v49, %v716_v30  ;;  %v2285_v28 = vsel %vm437_vm6, %v438_v20, %v436_v62 }
  0xd0   : > { %v2181_v5 = vpop.xlane.xlu2 %668  ;;  %1414 = vrsqrt.f32 %v2179_v4  ;;  %v477_v46 = vmul.f32 %v2191_v35, %v2160_v47  ;;  %v2204_v0 = vpop.eup %1412  ;;  %v729_v44 = vmul.f32 %v2167_v6, %v728_v37  ;;  %v892_v20 = vmax.f32 %v2285_v28, 1e-12 }
  0xd1   : > { %v2183_v17 = vpop.xlane.xlu0 %665  ;;  %1416 = vrsqrt.f32 %v2181_v5  ;;  %v738_v45 = vmul.f32 %v2188_v32, %v737_v2  ;;  %v465_v23 = vmul.f32 %v2204_v0, %v2162_v48  ;;  %v445_v59 = vmul.f32 %v2169_v15, %v444_v42 }
  0xd2   : > { %v478_v12 = vmul.f32 %v2191_v35, %v477_v46  ;;  %1418 = vrsqrt.f32 %v2183_v17  ;;  %v718_v57 = vmul.f32 %v717_v9, %v2146_v11  ;;  %v730_v40 = vmul.f32 %v729_v44, %v2149_v38 }
  0xd3   : > { %v739_v60 = vmul.f32 0.5, %v738_v45  ;;  %v466_v49 = vmul.f32 %v2204_v0, %v465_v23  ;;  %v446_v14 = vmul.f32 %v445_v59, %v2151_v13  ;;  %v2281_v46 = vsel %vm461_vm5, %v462_v56, %v460_v61 }
  0xd4   : > { %v479_v3 = vmul.f32 0.5, %v478_v12  ;;  %v720_v30 = vsel %vm719_vm7, %v2146_v11, %v718_v57  ;;  %v732_v7 = vsel %vm731_vm8, %v2149_v38, %v730_v40  ;;  %v894_v12 = vmax.f32 %v2281_v46, 1e-12 }
  0xd5   : > { %v740_v18 = vsub.f32 1.5, %v739_v60  ;;  %v467_v25 = vmul.f32 0.5, %v466_v49  ;;  %v448_v10 = vsel %vm447_vm9, %v2151_v13, %v446_v14  ;;  %vm483_vm15 = vcmp.eq.f32.partialorder %v2160_v47, inf }
  0xd6   : > { %v2217_v16 = vpop.eup %1414  ;;  %v480_v19 = vsub.f32 1.5, %v479_v3  ;;  %v2322_v9 = vsel %vm733_vm11, %v734_v50, %v732_v7  ;;  %v2326_v44 = vsel %vm449_vm12, %v450_v24, %v448_v10  ;;  %vm485_vm0 = vcmp.eq.f32.partialorder %v2160_v47, 0.0 }
  0xd7   : > { %v2199_v63 = vpop.xlane.xlu1 %671  ;;  %v2225_v21 = vpop.eup %1416  ;;  %v489_v33 = vmul.f32 %v2217_v16, %v2179_v4  ;;  %v741_v37 = vmul.f32 %v2188_v32, %v740_v18  ;;  %v468_v23 = vsub.f32 1.5, %v467_v25  ;;  %v486_v59 = vand.u32 2147483648, %v2160_v47 }
  0xd8   : > { %v2209_v55 = vpop.xlane.xlu2 %402  ;;  %1420 = vrsqrt.f32 %v2199_v63  ;;  %v761_v34 = vmul.f32 %v2225_v21, %v2181_v5  ;;  %v2248_v15 = vpop.eup %1418  ;;  %v481_v42 = vmul.f32 %v2191_v35, %v480_v19  ;;  %v2318_v35 = vsel %vm721_vm10, %v722_v8, %v720_v30 }
  0xd9   : > { %v2211_v52 = vpop.xlane.xlu0 %399  ;;  %1422 = vrsqrt.f32 %v2209_v55  ;;  %v490_v31 = vmul.f32 %v2217_v16, %v489_v33  ;;  %v749_v27 = vmul.f32 %v2248_v15, %v2183_v17  ;;  %v742_v11 = vmul.f32 %v741_v37, %v2157_v58 }
  0xda   : > { %v762_v43 = vmul.f32 %v2225_v21, %v761_v34  ;;  %1424 = vrsqrt.f32 %v2211_v52  ;;  %v482_v8 = vmul.f32 %v481_v42, %v2160_v47  ;;  %vm471_vm1 = vcmp.eq.f32.partialorder %v2162_v48, inf }
  0xdb   : > { %v491_v45 = vmul.f32 0.5, %v490_v31  ;;  %v750_v22 = vmul.f32 %v2248_v15, %v749_v27  ;;  %v469_v13 = vmul.f32 %v2204_v0, %v468_v23  ;;  %v474_v34 = vand.u32 2147483648, %v2162_v48 }
  0xdc   : > { %v763_v56 = vmul.f32 0.5, %v762_v43  ;;  %v909_v61 = vmax.f32 %v2318_v35, 1e-12  ;;  %v910_v40 = vmax.f32 %v2322_v9, 1e-12  ;;  %vm473_vm2 = vcmp.eq.f32.partialorder %v2162_v48, 0.0 }
  0xdd   : > { %v492_v38 = vsub.f32 1.5, %v491_v45  ;;  %v751_v50 = vmul.f32 0.5, %v750_v22  ;;  %v893_v14 = vmax.f32 %v2326_v44, 1e-12  ;;  %vm495_vm3 = vcmp.eq.f32.partialorder %v2179_v4, inf }
  0xde   : > { %v2263_v39 = vpop.eup %1420  ;;  %v764_v33 = vsub.f32 1.5, %v763_v56  ;;  %v498_v0 = vand.u32 2147483648, %v2179_v4  ;;  %v744_v24 = vsel %vm743_vm13, %v2157_v58, %v742_v11  ;;  %v484_v25 = vsel %vm483_vm15, %v2160_v47, %v482_v8 }
  0xdf   : > { %v2246_v6 = vpop.xlane.xlu1 %405  ;;  %v773_v29 = vmul.f32 %v2263_v39, %v2199_v63  ;;  %v2290_v53 = vpop.eup %1422  ;;  %v493_v27 = vmul.f32 %v2217_v16, %v492_v38  ;;  %v470_v30 = vmul.f32 %v469_v13, %v2162_v48  ;;  %v752_v7 = vsub.f32 1.5, %v751_v50 }
  0xe0   : > { %v2275_v1 = vpop.xlane.xlu2 %677  ;;  %1426 = vrsqrt.f32 %v2246_v6  ;;  %v2308_v41 = vpop.eup %1424  ;;  %v513_v32 = vmul.f32 %v2290_v53, %v2209_v55  ;;  %vm767_vm4 = vcmp.eq.f32.partialorder %v2181_v5, inf  ;;  %v2375_v16 = vsel %vm745_vm14, %v746_v26, %v744_v24 }
  0xe1   : > { %v2277_v2 = vpop.xlane.xlu0 %674  ;;  %v774_v36 = vmul.f32 %v2263_v39, %v773_v29  ;;  %1428 = vrsqrt.f32 %v2275_v1  ;;  %v501_v49 = vmul.f32 %v2308_v41, %v2211_v52  ;;  %v765_v29 = vmul.f32 %v2225_v21, %v764_v33 }
  0xe2   : > { %v514_v57 = vmul.f32 %v2290_v53, %v513_v32  ;;  %1430 = vrsqrt.f32 %v2277_v2  ;;  %vm497_vm5 = vcmp.eq.f32.partialorder %v2179_v4, 0.0  ;;  %v770_v21 = vand.u32 2147483648, %v2181_v5 }
  0xe3   : > { %v775_v62 = vmul.f32 0.5, %v774_v36  ;;  %v502_v10 = vmul.f32 %v2308_v41, %v501_v49  ;;  %v758_v56 = vand.u32 2147483648, %v2183_v17  ;;  %v2385_v36 = vsel %vm485_vm0, %v486_v59, %v484_v25 }
  0xe4   : > { %v515_v45 = vmul.f32 0.5, %v514_v57  ;;  %v494_v32 = vmul.f32 %v493_v27, %v2179_v4  ;;  %v766_v58 = vmul.f32 %v765_v29, %v2181_v5  ;;  %vm769_vm6 = vcmp.eq.f32.partialorder %v2181_v5, 0.0 }
  0xe5   : > { %v776_v42 = vsub.f32 1.5, %v775_v62  ;;  %vm755_vm7 = vcmp.eq.f32.partialorder %v2183_v17, inf  ;;  %v472_v26 = vsel %vm471_vm1, %v2162_v48, %v470_v30  ;;  %v753_v11 = vmul.f32 %v2248_v15, %v752_v7 }
  0xe6   : > { %v2332_v3 = vpop.eup %1426  ;;  %v503_v8 = vmul.f32 0.5, %v502_v10  ;;  %v516_v13 = vsub.f32 1.5, %v515_v45  ;;  %vm757_vm8 = vcmp.eq.f32.partialorder %v2183_v17, 0.0  ;;  %vm779_vm9 = vcmp.eq.f32.partialorder %v2199_v63, inf }
  0xe7   : > { %v2330_v60 = vpop.xlane.xlu1 %680  ;;  %v525_v18 = vmul.f32 %v2332_v3, %v2246_v6  ;;  %v2355_v43 = vpop.eup %1428  ;;  %v777_v33 = vmul.f32 %v2263_v39, %v776_v42  ;;  %v782_v15 = vand.u32 2147483648, %v2199_v63  ;;  %v496_v39 = vsel %vm495_vm3, %v2179_v4, %v494_v32 }
  0xe8   : > { %v2351_v19 = vpop.xlane.xlu2 %411  ;;  %v797_v37 = vmul.f32 %v2355_v43, %v2275_v1  ;;  %1432 = vrsqrt.f32 %v2330_v60  ;;  %v2381_v22 = vpop.eup %1430  ;;  %v768_v24 = vsel %vm767_vm4, %v2181_v5, %v766_v58  ;;  %vm781_vm10 = vcmp.eq.f32.partialorder %v2199_v63, 0.0 }
  0xe9   : > { %v2353_v31 = vpop.xlane.xlu0 %408  ;;  %v526_v23 = vmul.f32 %v2332_v3, %v525_v18  ;;  %1434 = vrsqrt.f32 %v2351_v19  ;;  %v785_v50 = vmul.f32 %v2381_v22, %v2277_v2  ;;  %v2411_v18 = vsel %vm473_vm2, %v474_v34, %v472_v26 }
  0xea   : > { %v798_v47 = vmul.f32 %v2355_v43, %v797_v37  ;;  %1436 = vrsqrt.f32 %v2353_v31  ;;  %v754_v25 = vmul.f32 %v753_v11, %v2183_v17  ;;  %vm519_vm11 = vcmp.eq.f32.partialorder %v2209_v55, inf }
  0xeb   : > { %v527_v62 = vmul.f32 0.5, %v526_v23  ;;  %v504_v27 = vsub.f32 1.5, %v503_v8  ;;  %v778_v10 = vmul.f32 %v777_v33, %v2199_v63  ;;  %v517_v37 = vmul.f32 %v2290_v53, %v516_v13 }
  0xec   : > { %v799_v48 = vmul.f32 0.5, %v798_v47  ;;  %v786_v42 = vmul.f32 %v2381_v22, %v785_v50  ;;  %v522_v45 = vand.u32 2147483648, %v2209_v55  ;;  %v895_v26 = vmax.f32 %v2411_v18, 1e-12 }
  0xed   : > { %v528_v23 = vsub.f32 1.5, %v527_v62  ;;  %v2444_v11 = vsel %vm497_vm5, %v498_v0, %v496_v39  ;;  %vm521_vm12 = vcmp.eq.f32.partialorder %v2209_v55, 0.0  ;;  %vm507_vm13 = vcmp.eq.f32.partialorder %v2211_v52, inf }
  0xee   : > { %v2407_v57 = vpop.eup %1432  ;;  %v510_v53 = vand.u32 2147483648, %v2211_v52  ;;  %v2452_v8 = vsel %vm769_vm6, %v770_v21, %v768_v24  ;;  %v756_v47 = vsel %vm755_vm7, %v2183_v17, %v754_v25  ;;  %v505_v4 = vmul.f32 %v2308_v41, %v504_v27 }
  0xef   : > { %v2397_v59 = vpop.xlane.xlu1 %414  ;;  %v809_v34 = vmul.f32 %v2407_v57, %v2330_v60  ;;  %v2429_v7 = vpop.eup %1434  ;;  %v800_v0 = vsub.f32 1.5, %v799_v48  ;;  %v780_v13 = vsel %vm779_vm9, %v2199_v63, %v778_v10  ;;  %v518_v50 = vmul.f32 %v517_v37, %v2209_v55 }
  0xf0   : > { %v2425_v29 = vpop.xlane.xlu2 %686  ;;  %1438 = vrsqrt.f32 %v2397_v59  ;;  %v549_v58 = vmul.f32 %v2429_v7, %v2351_v19  ;;  %v2458_v33 = vpop.eup %1436  ;;  %vm531_vm14 = vcmp.eq.f32.partialorder %v2246_v6, inf  ;;  %v787_v5 = vmul.f32 0.5, %v786_v42 }
  0xf1   : > { %v2427_v30 = vpop.xlane.xlu0 %683  ;;  %v810_v32 = vmul.f32 %v2407_v57, %v809_v34  ;;  %1440 = vrsqrt.f32 %v2425_v29  ;;  %v529_v62 = vmul.f32 %v2332_v3, %v528_v23  ;;  %v534_v39 = vand.u32 2147483648, %v2246_v6 }
  0xf2   : > { %v550_v24 = vmul.f32 %v2429_v7, %v549_v58  ;;  %v537_v41 = vmul.f32 %v2458_v33, %v2353_v31  ;;  %v2480_v3 = vsel %vm757_vm8, %v758_v56, %v756_v47  ;;  %vm509_vm15 = vcmp.eq.f32.partialorder %v2211_v52, 0.0 }
  0xf3   : > { %v811_v21 = vmul.f32 0.5, %v810_v32  ;;  %1442 = vrsqrt.f32 %v2427_v30  ;;  %v2486_v10 = vsel %vm781_vm10, %v782_v15, %v780_v13  ;;  %v506_v37 = vmul.f32 %v505_v4, %v2211_v52 }
  0xf4   : > { %vm533_vm0 = vcmp.eq.f32.partialorder %v2246_v6, 0.0  ;;  %v801_v42 = vmul.f32 %v2355_v43, %v800_v0  ;;  %vm803_vm1 = vcmp.eq.f32.partialorder %v2275_v1, inf  ;;  %v520_v23 = vsel %vm519_vm11, %v2209_v55, %v518_v50 }
  0xf5   : > { %v788_v63 = vsub.f32 1.5, %v787_v5  ;;  %v812_v15 = vsub.f32 1.5, %v811_v21  ;;  %v530_v32 = vmul.f32 %v529_v62, %v2246_v6  ;;  %v806_v58 = vand.u32 2147483648, %v2275_v1 }
  0xf6   : > { %v2472_v27 = vpop.eup %1438  ;;  %v551_v43 = vmul.f32 0.5, %v550_v24  ;;  %v538_v47 = vmul.f32 %v2458_v33, %v537_v41  ;;  %v2514_v21 = vsel %vm521_vm12, %v522_v45, %v520_v23  ;;  %v508_v62 = vsel %vm507_vm13, %v2211_v52, %v506_v37 }
  0xf7   : > { %v2470_v25 = vpop.xlane.xlu1 %689  ;;  %v561_v17 = vmul.f32 %v2472_v27, %v2397_v59  ;;  %v2494_v56 = vpop.eup %1440  ;;  %v802_v24 = vmul.f32 %v801_v42, %v2275_v1  ;;  %vm805_vm2 = vcmp.eq.f32.partialorder %v2275_v1, 0.0  ;;  %vm791_vm3 = vcmp.eq.f32.partialorder %v2277_v2, inf }
  0xf8   : > { %1444 = vrsqrt.f32 %v2470_v25  ;;  %v2503_v4 = vpop.xlane.xlu2 %420  ;;  %v833_v5 = vmul.f32 %v2494_v56, %v2425_v29  ;;  %v794_v41 = vand.u32 2147483648, %v2277_v2  ;;  %v789_v49 = vmul.f32 %v2381_v22, %v788_v63 }
  0xf9   : > { %v2505_v0 = vpop.xlane.xlu0 %417  ;;  %v562_v50 = vmul.f32 %v2472_v27, %v561_v17  ;;  %v2523_v17 = vpop.eup %1442  ;;  %v813_v55 = vmul.f32 %v2407_v57, %v812_v15  ;;  %1446 = vrsqrt.f32 %v2503_v4  ;;  %v532_v37 = vsel %vm531_vm14, %v2246_v6, %v530_v32 }
  0xfa   : > { %v834_v45 = vmul.f32 %v2494_v56, %v833_v5  ;;  %v552_v42 = vsub.f32 1.5, %v551_v43  ;;  %v539_v23 = vmul.f32 0.5, %v538_v47  ;;  %v821_v13 = vmul.f32 %v2523_v17, %v2427_v30 }
  0xfb   : > { %vm815_vm4 = vcmp.eq.f32.partialorder %v2330_v60, inf  ;;  %v818_v22 = vand.u32 2147483648, %v2330_v60  ;;  %v563_v57 = vmul.f32 0.5, %v562_v50  ;;  %v2543_v32 = vsel %vm509_vm15, %v510_v53, %v508_v62 }
  0xfc   : > { %v835_v63 = vmul.f32 0.5, %v834_v45  ;;  %vm793_vm5 = vcmp.eq.f32.partialorder %v2277_v2, 0.0  ;;  %v822_v43 = vmul.f32 %v2523_v17, %v821_v13  ;;  %v2551_v5 = vsel %vm533_vm0, %v534_v39, %v532_v37 }
  0xfd   : > { %v804_v50 = vsel %vm803_vm1, %v2275_v1, %v802_v24  ;;  %v790_v45 = vmul.f32 %v789_v49, %v2277_v2  ;;  %v814_v52 = vmul.f32 %v813_v55, %v2330_v60  ;;  %vm817_vm6 = vcmp.eq.f32.partialorder %v2330_v60, 0.0 }
  0xfe   : > { %v2534_v34 = vpop.eup %1444  ;;  %vm555_vm7 = vcmp.eq.f32.partialorder %v2351_v19, inf  ;;  %v553_v53 = vmul.f32 %v2429_v7, %v552_v42  ;;  %v540_v13 = vsub.f32 1.5, %v539_v23  ;;  %1448 = vrsqrt.f32 %v2505_v0 }
  0xff   : > { %v845_v47 = vmul.f32 %v2534_v34, %v2470_v25  ;;  %v2563_v6 = vpop.xlane.xlu1 %423  ;;  %v2565_v39 = vpop.eup %1446  ;;  %v564_v49 = vsub.f32 1.5, %v563_v57  ;;  %v836_v37 = vsub.f32 1.5, %v835_v63  ;;  %v823_v55 = vmul.f32 0.5, %v822_v43 }
 0x100   : > { %v558_v48 = vand.u32 2147483648, %v2351_v19  ;;  %v585_v7 = vmul.f32 %v2565_v39, %v2503_v4  ;;  %v2576_v23 = vsel %vm805_vm2, %v806_v58, %v804_v50  ;;  %v792_v57 = vsel %vm791_vm3, %v2277_v2, %v790_v45  ;;  %v2594_v15 = vpop.xlane.xlu2 %695 }
 0x101   : > { %v846_v62 = vmul.f32 %v2534_v34, %v845_v47  ;;  %v2572_v42 = vpop.xlane.xlu0 %692  ;;  %vm557_vm8 = vcmp.eq.f32.partialorder %v2351_v19, 0.0  ;;  %vm543_vm9 = vcmp.eq.f32.partialorder %v2353_v31, inf  ;;  %v546_v63 = vand.u32 2147483648, %v2353_v31 }
 0x102   : > { %v816_v43 = vsel %vm815_vm4, %v2330_v60, %v814_v52  ;;  %v554_v47 = vmul.f32 %v553_v53, %v2351_v19  ;;  %v541_v1 = vmul.f32 %v2458_v33, %v540_v13  ;;  %vm567_vm10 = vcmp.eq.f32.partialorder %v2397_v59, inf }
 0x103   : > { %v847_v38 = vmul.f32 0.5, %v846_v62  ;;  %v586_v58 = vmul.f32 %v2565_v39, %v585_v7  ;;  %v565_v50 = vmul.f32 %v2472_v27, %v564_v49  ;;  %v837_v45 = vmul.f32 %v2494_v56, %v836_v37 }
 0x104   : > { %v824_v62 = vsub.f32 1.5, %v823_v55  ;;  %1450 = vrsqrt.f32 %v2563_v6  ;;  %v2596_v24 = vpop.eup %1448  ;;  %v570_v52 = vand.u32 2147483648, %v2397_v59  ;;  %vm839_vm11 = vcmp.eq.f32.partialorder %v2425_v29, inf }
 0x105   : > { %v848_v33 = vsub.f32 1.5, %v847_v38  ;;  %v587_v53 = vmul.f32 0.5, %v586_v58  ;;  %v2605_v27 = vsel %vm793_vm5, %v794_v41, %v792_v57  ;;  %vm545_vm12 = vcmp.eq.f32.partialorder %v2353_v31, 0.0 }
 0x106   : > { %vm569_vm13 = vcmp.eq.f32.partialorder %v2397_v59, 0.0  ;;  %v842_v56 = vand.u32 2147483648, %v2425_v29  ;;  %v573_v49 = vmul.f32 %v2596_v24, %v2505_v0  ;;  %v2614_v38 = vsel %vm817_vm6, %v818_v22, %v816_v43 }
 0x107   : > { %v556_v37 = vsel %vm555_vm7, %v2351_v19, %v554_v47  ;;  %v542_v2 = vmul.f32 %v541_v1, %v2353_v31  ;;  %vm841_vm14 = vcmp.eq.f32.partialorder %v2425_v29, 0.0  ;;  %vm827_vm15 = vcmp.eq.f32.partialorder %v2427_v30, inf  ;;  %v2630_v47 = vpop.xlane.xlu1 %698 }
 0x108   : > { %1452 = vrsqrt.f32 %v2594_v15  ;;  %v566_v41 = vmul.f32 %v565_v50, %v2397_v59  ;;  %v838_v55 = vmul.f32 %v837_v45, %v2425_v29  ;;  %v825_v60 = vmul.f32 %v2523_v17, %v824_v62 }
 0x109   : > { %v574_v22 = vmul.f32 %v2596_v24, %v573_v49  ;;  %v830_v7 = vand.u32 2147483648, %v2427_v30  ;;  %v849_v57 = vmul.f32 %v2534_v34, %v848_v33  ;;  %vm851_vm0 = vcmp.eq.f32.partialorder %v2470_v25, inf  ;;  %v2645_v33 = vpop.xlane.xlu0 %426 }
 0x10a   : > { %v588_v43 = vsub.f32 1.5, %v587_v53  ;;  %v1451_v1 = vpop.eup %1450  ;;  %v854_v50 = vand.u32 2147483648, %v2470_v25  ;;  %1454 = vrsqrt.f32 %v2572_v42  ;;  %v2638_v45 = vsel %vm557_vm8, %v558_v48, %v556_v37 }
 0x10b   : > { %v575_v13 = vmul.f32 0.5, %v574_v22  ;;  %v544_v34 = vsel %vm543_vm9, %v2353_v31, %v542_v2  ;;  %vm829_vm1 = vcmp.eq.f32.partialorder %v2427_v30, 0.0  ;;  %v597_v62 = vmul.f32 %v1451_v1, %v2563_v6 }
 0x10c   : > { %v568_v53 = vsel %vm567_vm10, %v2397_v59, %v566_v41  ;;  %v840_v19 = vsel %vm839_vm11, %v2425_v29, %v838_v55  ;;  %v826_v48 = vmul.f32 %v825_v60, %v2427_v30  ;;  %vm853_vm2 = vcmp.eq.f32.partialorder %v2470_v25, 0.0 }
 0x10d   : > { %1456 = vrsqrt.f32 %v2630_v47  ;;  %v850_v37 = vmul.f32 %v849_v57, %v2470_v25  ;;  %v589_v2 = vmul.f32 %v2565_v39, %v588_v43  ;;  %v576_v22 = vsub.f32 1.5, %v575_v13 }
 0x10e   : > { %v1453_v49 = vpop.eup %1452  ;;  %v598_v17 = vmul.f32 %v1451_v1, %v597_v62  ;;  %vm591_vm3 = vcmp.eq.f32.partialorder %v2503_v4, inf  ;;  %1458 = vrsqrt.f32 %v2645_v33  ;;  %v2666_v55 = vsel %vm545_vm12, %v546_v63, %v544_v34 }
 0x10f   : > { %v869_v41 = vmul.f32 %v1453_v49, %v2594_v15  ;;  %v2670_v60 = vsel %vm569_vm13, %v570_v52, %v568_v53  ;;  %v594_v39 = vand.u32 2147483648, %v2503_v4  ;;  %v2675_v43 = vsel %vm841_vm14, %v842_v56, %v840_v19 }
 0x110   : > { %v599_v13 = vmul.f32 0.5, %v598_v17  ;;  %v1455_v57 = vpop.eup %1454  ;;  %v828_v62 = vsel %vm827_vm15, %v2427_v30, %v826_v48  ;;  %v2684_v31 = vmul.f32 %v908_v54, %v892_v20  ;;  %v852_v59 = vsel %vm851_vm0, %v2470_v25, %v850_v37 }
 0x111   : > { %v870_v58 = vmul.f32 %v1453_v49, %v869_v41  ;;  %v590_v63 = vmul.f32 %v589_v2, %v2503_v4  ;;  %vm593_vm4 = vcmp.eq.f32.partialorder %v2503_v4, 0.0  ;;  %v577_v29 = vmul.f32 %v2596_v24, %v576_v22 }
 0x112   : > { %v857_v52 = vmul.f32 %v1455_v57, %v2572_v42  ;;  %vm579_vm5 = vcmp.eq.f32.partialorder %v2505_v0, inf  ;;  %v600_v28 = vsub.f32 1.5, %v599_v13  ;;  %1460 = vrcp.f32 %v2684_v31 }
 0x113   : > { %v1457_v56 = vpop.eup %1456  ;;  %v871_v17 = vmul.f32 0.5, %v870_v58  ;;  %v2699_v51 = vmul.f32 %v910_v40, %v894_v12  ;;  %v901_v54 = vmax.f32 %v2666_v55, 1e-12  ;;  %v582_v20 = vand.u32 2147483648, %v2505_v0 }
 0x114   : > { %v858_v24 = vmul.f32 %v1455_v57, %v857_v52  ;;  %v881_v34 = vmul.f32 %v1457_v56, %v2630_v47  ;;  %v1459_v53 = vpop.eup %1458  ;;  %v903_v19 = vmax.f32 %v2670_v60, 1e-12  ;;  %v919_v58 = vmax.f32 %v2675_v43, 1e-12 }
 0x115   : > { %v2708_v48 = vsel %vm829_vm1, %v830_v7, %v828_v62  ;;  %v872_v46 = vsub.f32 1.5, %v871_v17  ;;  %v2712_v12 = vsel %vm853_vm2, %v854_v50, %v852_v59  ;;  %vm581_vm6 = vcmp.eq.f32.partialorder %v2505_v0, 0.0 }
 0x116   : > { %vm603_vm7 = vcmp.eq.f32.partialorder %v2563_v6, inf  ;;  %v859_v9 = vmul.f32 0.5, %v858_v24  ;;  %v882_v40 = vmul.f32 %v1457_v56, %v881_v34  ;;  %v609_v37 = vmul.f32 %v1459_v53, %v2645_v33 }
 0x117   : > { %v592_v2 = vsel %vm591_vm3, %v2503_v4, %v590_v63  ;;  %v578_v30 = vmul.f32 %v577_v29, %v2505_v0  ;;  %v601_v7 = vmul.f32 %v1451_v1, %v600_v28  ;;  %1462 = vrcp.f32 %v2699_v51 }
 0x118   : > { %v873_v25 = vmul.f32 %v1453_v49, %v872_v46  ;;  %v860_v50 = vsub.f32 1.5, %v859_v9  ;;  %v883_v22 = vmul.f32 0.5, %v882_v40  ;;  %v610_v41 = vmul.f32 %v1459_v53, %v609_v37  ;;  %v2722_v13 = vpop.eup %1460 }
 0x119   : > { %v918_v62 = vmax.f32 %v2708_v48, 1e-12  ;;  %vm605_vm8 = vcmp.eq.f32.partialorder %v2563_v6, 0.0  ;;  %v606_v59 = vand.u32 2147483648, %v2563_v6  ;;  %vm875_vm9 = vcmp.eq.f32.partialorder %v2594_v15, inf }
 0x11a   : > { %v920_v63 = vmax.f32 %v2712_v12, 1e-12  ;;  %vm877_vm10 = vcmp.eq.f32.partialorder %v2594_v15, 0.0  ;;  %v878_v1 = vand.u32 2147483648, %v2594_v15  ;;  %v884_v49 = vsub.f32 1.5, %v883_v22 }
 0x11b   : > { %v611_v29 = vmul.f32 0.5, %v610_v41  ;;  %v2733_v52 = vsel %vm593_vm4, %v594_v39, %v592_v2  ;;  %v602_v28 = vmul.f32 %v601_v7, %v2563_v6  ;;  %vm863_vm11 = vcmp.eq.f32.partialorder %v2572_v42, inf }
 0x11c   : > { %v866_v17 = vand.u32 2147483648, %v2572_v42  ;;  %v941_v24 = vmul.f32 %v2722_v13, %v2684_v31  ;;  %v580_v34 = vsel %vm579_vm5, %v2505_v0, %v578_v30  ;;  %v874_v46 = vmul.f32 %v873_v25, %v2594_v15 }
 0x11d   : > { %v861_v9 = vmul.f32 %v1455_v57, %v860_v50  ;;  %v612_v40 = vsub.f32 1.5, %v611_v29  ;;  %v2744_v4 = vpop.eup %1462  ;;  %vm887_vm12 = vcmp.eq.f32.partialorder %v2630_v47, inf  ;;  %v890_v39 = vand.u32 2147483648, %v2630_v47 }
 0x11e   : > { %v942_v37 = vsub.f32 1.0, %v941_v24  ;;  %v2752_v2 = vmul.f32 %v909_v61, %v893_v14  ;;  %v905_v7 = vmax.f32 %v2733_v52, 1e-12  ;;  %vm865_vm13 = vcmp.eq.f32.partialorder %v2572_v42, 0.0 }
 0x11f   : > { %v885_v30 = vmul.f32 %v1457_v56, %v884_v49  ;;  %vm615_vm14 = vcmp.eq.f32.partialorder %v2645_v33, inf  ;;  %v971_v57 = vmul.f32 %v2744_v4, %v2699_v51  ;;  %v2761_v25 = vsel %vm581_vm6, %v582_v20, %v580_v34 }
 0x120   : > { %v604_v35 = vsel %vm603_vm7, %v2563_v6, %v602_v28  ;;  %v613_v44 = vmul.f32 %v1459_v53, %v612_v40  ;;  %v949_v61 = vand.u32 2147483647, %v2684_v31  ;;  %v876_v14 = vsel %vm875_vm9, %v2594_v15, %v874_v46 }
 0x121   : > { %v862_v56 = vmul.f32 %v861_v9, %v2572_v42  ;;  %vm889_vm15 = vcmp.eq.f32.partialorder %v2630_v47, 0.0  ;;  %v943_v50 = vmul.f32 %v2722_v13, %v942_v37  ;;  %v972_v0 = vsub.f32 1.0, %v971_v57 }
 0x122   : > { %vm617_vm0 = vcmp.eq.f32.partialorder %v2645_v33, 0.0  ;;  %v618_v20 = vand.u32 2147483648, %v2645_v33  ;;  %vm945_vm1 = vweird.f32 %v2684_v31  ;;  %v951_v53 = vand.u32 2147483648, %v2684_v31 }
 0x123   : > { %1464 = vrcp.f32 %v2752_v2  ;;  %v904_v22 = vmax.f32 %v2761_v25, 1e-12  ;;  %v2781_v41 = vsel %vm605_vm8, %v606_v59, %v604_v35  ;;  %v886_v49 = vmul.f32 %v885_v30, %v2630_v47 }
 0x124   : > { %v979_v29 = vand.u32 2147483647, %v2699_v51  ;;  %v2787_v28 = vsel %vm877_vm10, %v878_v1, %v876_v14  ;;  %v614_v24 = vmul.f32 %v613_v44, %v2645_v33  ;;  %vm2790_vm2 = vcmp.eq.f32.partialorder %v949_v61, 8.507059e+37 }
 0x125   : > { %v3221_v6 = vmax.f32 %v2375_v16, 1e-12  ;;  %v864_v46 = vsel %vm863_vm11, %v2572_v42, %v862_v56  ;;  %v944_v15 = vadd.f32 %v2722_v13, %v943_v50  ;;  %vm946_vm3 = vweird.f32 %v2722_v13 }
 0x126   : > { %v973_v1 = vmul.f32 %v2744_v4, %v972_v0  ;;  %v906_v9 = vmax.f32 %v2781_v41, 1e-12  ;;  %v952_v40 = vor.u32 1.1754944e-38, %v951_v53  ;;  %vm975_vm4 = vweird.f32 %v2699_v51  ;;  %vm2832_vm7 = vmor %vm945_vm1, %vm946_vm3 }
 0x127   : > { %v2798_v59 = vmul.f32 %v3221_v6, %v895_v26  ;;  %v922_v16 = vmax.f32 %v2787_v28, 1e-12  ;;  %v888_v18 = vsel %vm887_vm12, %v2630_v47, %v886_v49  ;;  %vm1181_vm5 = vcmask 7168  }
 0x128   : > { %vm2813_vm6 = vcmp.eq.f32.partialorder %v979_v29, 8.507059e+37  ;;  %v3224_v37 = vmax.f32 %v2444_v11, 1e-12  ;;  %v3225_v30 = vmax.f32 %v2452_v8, 1e-12  ;;  %v2825_v44 = vsel %vm865_vm13, %v866_v17, %v864_v46  ;;  %v302_v29 = vpop.xlane.xlu2 %301 }
 0x129   : > { %1466 = vrcp.f32 %v2798_v59  ;;  %v1465_v35 = vpop.eup %1464  ;;  %v616_v61 = vsel %vm615_vm14, %v2645_v33, %v614_v24  ;;  %v981_v11 = vand.u32 2147483648, %v2699_v51  ;;  %v3228_v8 = vmax.f32 %v2385_v36, 1e-12 }
 0x12a   : > { %v2821_v57 = vmul.f32 %v3225_v30, %v3224_v37  ;;  %v3229_v56 = vmax.f32 %v2480_v3, 1e-12  ;;  %v948_v42 = vsel %vm2832_vm7, %v2722_v13, %v944_v15  ;;  %v974_v17 = vadd.f32 %v2744_v4, %v973_v1 }
 0x12b   : > { %vm976_vm8 = vweird.f32 %v2744_v4  ;;  %v956_v31 = vmul.f32 %v1465_v35, %v2752_v2  ;;  %v2851_v0 = vsel %vm889_vm15, %v890_v39, %v888_v18  ;;  %v964_v36 = vand.u32 2147483647, %v2752_v2 }
 0x12c   : > { %v2841_v50 = vmul.f32 %v3229_v56, %v3228_v8  ;;  %1468 = vrcp.f32 %v2821_v57  ;;  %v3230_v3 = vmax.f32 %v2543_v32, 1e-12  ;;  %v3231_v53 = vmax.f32 %v2486_v10, 1e-12  ;;  %vm2874_vm9 = vmor %vm975_vm4, %vm976_vm8 }
 0x12d   : > { %v2863_v13 = vsel %vm617_vm0, %v618_v20, %v616_v61  ;;  %v957_v24 = vsub.f32 1.0, %v956_v31  ;;  %v966_v47 = vand.u32 2147483648, %v2752_v2  ;;  %v921_v6 = vmax.f32 %v2825_v44, 1e-12 }
 0x12e   : > { %v2859_v49 = vmul.f32 %v3231_v53, %v3230_v3  ;;  %1470 = vrcp.f32 %v2841_v50  ;;  %v953_v32 = vsel %vm2790_vm2, %v952_v40, %v948_v42  ;;  %v982_v33 = vor.u32 1.1754944e-38, %v981_v11  ;;  %v308_v40 = vpop.xlane.xlu1 %307  ;;  %v305_v11 = vpop.xlane.xlu0 %304 }
 0x12f   : > { %v2867_v39 = vpop.eup %1466  ;;  %vm960_vm10 = vweird.f32 %v2752_v2  ;;  %v978_v20 = vsel %vm2874_vm9, %v2744_v4, %v974_v17  ;;  %v958_v46 = vmul.f32 %v1465_v35, %v957_v24  ;;  %vm961_vm11 = vweird.f32 %v1465_v35 }
 0x130   : > { %v986_v15 = vmul.f32 %v2867_v39, %v2798_v59  ;;  %v923_v34 = vmax.f32 %v2851_v0, 1e-12  ;;  %v907_v51 = vmax.f32 %v2863_v13, 1e-12  ;;  %v954_v1 = vmul.f32 %v953_v32, %v302_v29  ;;  %vm962_vm13 = vmor %vm960_vm10, %vm961_vm11 }
 0x131   : > { %1472 = vrcp.f32 %v2859_v49  ;;  %v959_v18 = vadd.f32 %v1465_v35, %v958_v46  ;;  %vm2887_vm12 = vcmp.eq.f32.partialorder %v964_v36, 8.507059e+37  ;;  %v967_v30 = vor.u32 1.1754944e-38, %v966_v47 }
 0x132   : > { %v987_v4 = vsub.f32 1.0, %v986_v15  ;;  %v2891_v61 = vpop.eup %1468  ;;  %v983_v14 = vsel %vm2813_vm6, %v982_v33, %v978_v20  ;;  %v994_v8 = vand.u32 2147483647, %v2798_v59  ;;  %v996_v56 = vand.u32 2147483648, %v2798_v59 }
 0x133   : > { %v3236_v42 = vmax.f32 %v2551_v5, 1e-12  ;;  %v3237_v17 = vmax.f32 %v2576_v23, 1e-12  ;;  %v984_v3 = vmul.f32 %v983_v14, %v308_v40  ;;  %v963_v53 = vsel %vm962_vm13, %v1465_v35, %v959_v18 }
 0x134   : > { %v1471_v36 = vpop.eup %1470  ;;  %v988_v26 = vmul.f32 %v2867_v39, %v987_v4  ;;  %v1016_v2 = vmul.f32 %v2891_v61, %v2821_v57  ;;  %v1182_v29 = vsel %vm1181_vm5, %v954_v1, 0.0  ;;  %v968_v24 = vsel %vm2887_vm12, %v967_v30, %v963_v53 }
 0x135   : > { %v2903_v31 = vmul.f32 %v3237_v17, %v3236_v42  ;;  %vm990_vm14 = vweird.f32 %v2798_v59  ;;  %v1001_v5 = vmul.f32 %v1471_v36, %v2841_v50  ;;  %v969_v23 = vmul.f32 %v968_v24, %v305_v11  ;;  %v311_v42 = vpop.xlane.xlu2 %310 }
 0x136   : > { %v989_v47 = vadd.f32 %v2867_v39, %v988_v26  ;;  %vm991_vm15 = vweird.f32 %v2867_v39  ;;  %v1017_v35 = vsub.f32 1.0, %v1016_v2  ;;  %vm2917_vm0 = vcmp.eq.f32.partialorder %v994_v8, 8.507059e+37 }
 0x137   : > { %v2915_v32 = vpop.eup %1472  ;;  %v1002_v33 = vsub.f32 1.0, %v1001_v5  ;;  %1474 = vrcp.f32 %v2903_v31  ;;  %v3240_v20 = vmax.f32 %v2514_v21, 1e-12  ;;  %v3241_v46 = vmax.f32 %v2605_v27, 1e-12  ;;  %vm2934_vm1 = vmor %vm990_vm14, %vm991_vm15 }
 0x138   : > { %v1185_v1 = vsel %vm1181_vm5, %v984_v3, 0.0  ;;  %v1183_v40 = vsel %vm1181_vm5, %v969_v23, 0.0  ;;  %v997_v18 = vor.u32 1.1754944e-38, %v996_v56  ;;  %v1031_v37 = vmul.f32 %v2915_v32, %v2859_v49 }
 0x139   : > { %v2926_v15 = vmul.f32 %v3241_v46, %v3240_v20  ;;  %v1184_v30 = vadd.f32 %v1183_v40, %v1182_v29  ;;  %v1018_v21 = vmul.f32 %v2891_v61, %v1017_v35  ;;  %v1003_v27 = vmul.f32 %v1471_v36, %v1002_v33  ;;  %v314_v33 = vpop.xlane.xlu0 %313 }
 0x13a   : > { %vm1006_vm2 = vweird.f32 %v1471_v36  ;;  %v993_v14 = vsel %vm2934_vm1, %v2867_v39, %v989_v47  ;;  %vm1005_vm3 = vweird.f32 %v2841_v50  ;;  %v1011_v11 = vand.u32 2147483648, %v2841_v50 }
 0x13b   : > { %v1032_v8 = vsub.f32 1.0, %v1031_v37  ;;  %v1186_v56 = vadd.f32 %v1185_v1, %v1184_v30  ;;  %v1004_v59 = vadd.f32 %v1471_v36, %v1003_v27  ;;  %v1009_v17 = vand.u32 2147483647, %v2841_v50  ;;  %vm2948_vm4 = vmor %vm1005_vm3, %vm1006_vm2  ;;  %v317_v30 = vpop.xlane.xlu1 %316 }
 0x13c   : > { %1476 = vrcp.f32 %v2926_v15  ;;  %v1024_v3 = vand.u32 2147483647, %v2821_v57  ;;  %v1026_v53 = vand.u32 2147483648, %v2821_v57  ;;  %v3246_v2 = vmax.f32 %v2614_v38, 1e-12 }
 0x13d   : > { %v1033_v39 = vmul.f32 %v2915_v32, %v1032_v8  ;;  %v2959_v24 = vpop.eup %1474  ;;  %v998_v50 = vsel %vm2917_vm0, %v997_v18, %v993_v14  ;;  %v1019_v5 = vadd.f32 %v2891_v61, %v1018_v21  ;;  %vm1021_vm6 = vweird.f32 %v2891_v61 }
 0x13e   : > { %v2957_v29 = vmul.f32 %v3246_v2, %v901_v54  ;;  %v1008_v23 = vsel %vm2948_vm4, %v1471_v36, %v1004_v59  ;;  %v999_v47 = vmul.f32 %v998_v50, %v311_v42  ;;  %v1012_v35 = vor.u32 1.1754944e-38, %v1011_v11 }
 0x13f   : > { %v1039_v55 = vand.u32 2147483647, %v2859_v49  ;;  %v1061_v38 = vmul.f32 %v2959_v24, %v2903_v31  ;;  %vm1020_vm7 = vweird.f32 %v2821_v57  ;;  %vm1010_vm8 = vcmp.eq.f32.partialorder %v1009_v17, 8.507059e+37 }
 0x140   : > { %vm1036_vm9 = vweird.f32 %v2915_v32  ;;  %v1041_v54 = vand.u32 2147483648, %v2859_v49  ;;  %vm2973_vm10 = vmor %vm1020_vm7, %vm1021_vm6  ;;  %v1013_v36 = vsel %vm1010_vm8, %v1012_v35, %v1008_v23  ;;  %v1034_v20 = vadd.f32 %v2915_v32, %v1033_v39 }
 0x141   : > { %v1062_v46 = vsub.f32 1.0, %v1061_v38  ;;  %1478 = vrcp.f32 %v2957_v29  ;;  %v1023_v57 = vsel %vm2973_vm10, %v2891_v61, %v1019_v5  ;;  %vm1025_vm11 = vcmp.eq.f32.partialorder %v1024_v3, 8.507059e+37 }
 0x142   : > { %v1477_v1 = vpop.eup %1476  ;;  %v1027_v40 = vor.u32 1.1754944e-38, %v1026_v53  ;;  %v1014_v18 = vmul.f32 %v1013_v36, %v314_v33  ;;  %v1187_v37 = vsel %vm1181_vm5, %v999_v47, 0.0  ;;  %vm1035_vm12 = vweird.f32 %v2859_v49 }
 0x143   : > { %vm2984_vm13 = vcmp.eq.f32.partialorder %v1039_v55, 8.507059e+37  ;;  %v1046_v21 = vmul.f32 %v1477_v1, %v2926_v15  ;;  %v1188_v27 = vadd.f32 %v1187_v37, %v1186_v56  ;;  %vm2991_vm14 = vmor %vm1035_vm12, %vm1036_vm9  ;;  %v1042_v61 = vor.u32 1.1754944e-38, %v1041_v54  ;;  %v323_v55 = vpop.xlane.xlu0 %322 }
 0x144   : > { %v1069_v11 = vand.u32 2147483647, %v2903_v31  ;;  %vm1050_vm15 = vweird.f32 %v2926_v15  ;;  %v1028_v8 = vsel %vm1025_vm11, %v1027_v40, %v1023_v57  ;;  %v1038_v49 = vsel %vm2991_vm14, %v2915_v32, %v1034_v20  ;;  %v320_v32 = vpop.xlane.xlu2 %319 }
 0x145   : > { %v1063_v42 = vmul.f32 %v2959_v24, %v1062_v46  ;;  %v1047_v59 = vsub.f32 1.0, %v1046_v21  ;;  %v1029_v56 = vmul.f32 %v1028_v8, %v317_v30  ;;  %v1189_v17 = vsel %vm1181_vm5, %v1014_v18, 0.0 }
 0x146   : > { %v3006_v3 = vmul.f32 %v919_v58, %v903_v19  ;;  %v3253_v53 = vmax.f32 %v2638_v45, 1e-12  ;;  %vm1066_vm0 = vweird.f32 %v2959_v24  ;;  %vm1051_vm1 = vweird.f32 %v1477_v1 }
 0x147   : > { %v3014_v39 = vpop.eup %1478  ;;  %v1048_v2 = vmul.f32 %v1477_v1, %v1047_v59  ;;  %v1054_v50 = vand.u32 2147483647, %v2926_v15  ;;  %v1043_v60 = vsel %vm2984_vm13, %v1042_v61, %v1038_v49  ;;  %v1056_v43 = vand.u32 2147483648, %v2926_v15  ;;  %vm3034_vm2 = vmor %vm1050_vm15, %vm1051_vm1 }
 0x148   : > { %v3012_v26 = vmul.f32 %v918_v62, %v3253_v53  ;;  %v1076_v45 = vmul.f32 %v3014_v39, %v2957_v29  ;;  %1480 = vrcp.f32 %v3006_v3  ;;  %v1190_v19 = vadd.f32 %v1189_v17, %v1188_v27 }
 0x149   : > { %v1064_v58 = vadd.f32 %v2959_v24, %v1063_v42  ;;  %v1049_v48 = vadd.f32 %v1477_v1, %v1048_v2  ;;  %v3029_v62 = vmul.f32 %v920_v63, %v904_v22  ;;  %v1044_v5 = vmul.f32 %v1043_v60, %v320_v32 }
 0x14a   : > { %v1071_v23 = vand.u32 2147483648, %v2903_v31  ;;  %v1077_v35 = vsub.f32 1.0, %v1076_v45  ;;  %1482 = vrcp.f32 %v3012_v26  ;;  %vm1065_vm3 = vweird.f32 %v2903_v31 }
 0x14b   : > { %vm3040_vm4 = vcmp.eq.f32.partialorder %v1069_v11, 8.507059e+37  ;;  %v1053_v12 = vsel %vm3034_vm2, %v1477_v1, %v1049_v48  ;;  %v1084_v63 = vand.u32 2147483647, %v2957_v29  ;;  %v1191_v22 = vsel %vm1181_vm5, %v1029_v56, 0.0  ;;  %vm3050_vm6 = vmor %vm1065_vm3, %vm1066_vm0  ;;  %v326_v1 = vpop.xlane.xlu1 %325  ;;  %v332_v48 = vpop.xlane.xlu0 %331 }
 0x14c   : > { %v1057_v33 = vor.u32 1.1754944e-38, %v1056_v43  ;;  %v1078_v31 = vmul.f32 %v3014_v39, %v1077_v35  ;;  %v1086_v38 = vand.u32 2147483648, %v2957_v29  ;;  %v1192_v54 = vadd.f32 %v1191_v22, %v1190_v19  ;;  %v329_v32 = vpop.xlane.xlu2 %328 }
 0x14d   : > { %v1068_v10 = vsel %vm3050_vm6, %v2959_v24, %v1064_v58  ;;  %vm1055_vm7 = vcmp.eq.f32.partialorder %v1054_v50, 8.507059e+37  ;;  %1484 = vrcp.f32 %v3029_v62  ;;  %v1193_v20 = vsel %vm1181_vm5, %v1044_v5, 0.0 }
 0x14e   : > { %v3060_v36 = vpop.eup %1480  ;;  %v1072_v46 = vor.u32 1.1754944e-38, %v1071_v23  ;;  %v1058_v57 = vsel %vm1055_vm7, %v1057_v33, %v1053_v12  ;;  %vm1080_vm8 = vweird.f32 %v2957_v29  ;;  %vm3064_vm9 = vcmp.eq.f32.partialorder %v1084_v63, 8.507059e+37 }
 0x14f   : > { %v1059_v40 = vmul.f32 %v1058_v57, %v323_v55  ;;  %v1106_v24 = vmul.f32 %v3060_v36, %v3006_v3  ;;  %v3074_v37 = vmul.f32 %v922_v16, %v906_v9  ;;  %v1079_v21 = vadd.f32 %v3014_v39, %v1078_v31 }
 0x150   : > { %v1483_v30 = vpop.eup %1482  ;;  %v1073_v4 = vsel %vm3040_vm4, %v1072_v46, %v1068_v10  ;;  %vm1081_vm10 = vweird.f32 %v3014_v39  ;;  %v1087_v27 = vor.u32 1.1754944e-38, %v1086_v38  ;;  %v1194_v14 = vadd.f32 %v1193_v20, %v1192_v54 }
 0x151   : > { %v1074_v61 = vmul.f32 %v1073_v4, %v326_v1  ;;  %v1107_v11 = vsub.f32 1.0, %v1106_v24  ;;  %v1091_v8 = vmul.f32 %v1483_v30, %v3012_v26  ;;  %vm1110_vm11 = vweird.f32 %v3006_v3  ;;  %vm3090_vm12 = vmor %vm1080_vm8, %vm1081_vm10 }
 0x152   : > { %v1114_v41 = vand.u32 2147483647, %v3006_v3  ;;  %v1116_v28 = vand.u32 2147483648, %v3006_v3  ;;  %1486 = vrcp.f32 %v3074_v37  ;;  %v1195_v16 = vsel %vm1181_vm5, %v1059_v40, 0.0 }
 0x153   : > { %v3085_v9 = vpop.eup %1484  ;;  %v1108_v42 = vmul.f32 %v3060_v36, %v1107_v11  ;;  %v1092_v59 = vsub.f32 1.0, %v1091_v8  ;;  %vm1095_vm13 = vweird.f32 %v3012_v26  ;;  %v1083_v56 = vsel %vm3090_vm12, %v3014_v39, %v1079_v21 }
 0x154   : > { %v1101_v17 = vand.u32 2147483648, %v3012_v26  ;;  %v1121_v53 = vmul.f32 %v3085_v9, %v3029_v62  ;;  %v3106_v29 = vmul.f32 %v921_v6, %v905_v7  ;;  %vm1111_vm14 = vweird.f32 %v3060_v36 }
 0x155   : > { %v1093_v2 = vmul.f32 %v1483_v30, %v1092_v59  ;;  %vm1096_vm15 = vweird.f32 %v1483_v30  ;;  %v1099_v50 = vand.u32 2147483647, %v3012_v26  ;;  %v1196_v60 = vadd.f32 %v1195_v16, %v1194_v14  ;;  %vm3130_vm1 = vmor %vm1110_vm11, %vm1111_vm14 }
 0x156   : > { %v1109_v39 = vadd.f32 %v3060_v36, %v1108_v42  ;;  %v1122_v43 = vsub.f32 1.0, %v1121_v53  ;;  %1488 = vrcp.f32 %v3106_v29  ;;  %v1197_v45 = vsel %vm1181_vm5, %v1074_v61, 0.0  ;;  %vm1097_vm0 = vmor %vm1095_vm13, %vm1096_vm15  ;;  %v341_v53 = vpop.xlane.xlu0 %340 }
 0x157   : > { %v1088_v52 = vsel %vm3064_vm9, %v1087_v27, %v1083_v56  ;;  %v1117_v7 = vor.u32 1.1754944e-38, %v1116_v28  ;;  %v1094_v44 = vadd.f32 %v1483_v30, %v1093_v2  ;;  %v1102_v58 = vor.u32 1.1754944e-38, %v1101_v17 }
 0x158   : > { %v3115_v6 = vpop.eup %1486  ;;  %v1089_v19 = vmul.f32 %v1088_v52, %v329_v32  ;;  %v1123_v5 = vmul.f32 %v3085_v9, %v1122_v43  ;;  %v3124_v23 = vmul.f32 %v923_v34, %v907_v51  ;;  %vm1100_vm2 = vcmp.eq.f32.partialorder %v1099_v50, 8.507059e+37  ;;  %v335_v34 = vpop.xlane.xlu1 %334 }
 0x159   : > { %v1098_v26 = vsel %vm1097_vm0, %v1483_v30, %v1094_v44  ;;  %v1129_v35 = vand.u32 2147483647, %v3029_v62  ;;  %v1151_v25 = vmul.f32 %v3115_v6, %v3074_v37  ;;  %v1198_v13 = vadd.f32 %v1197_v45, %v1196_v60  ;;  %v338_v30 = vpop.xlane.xlu2 %337 }
 0x15a   : > { %v1113_v0 = vsel %vm3130_vm1, %v3060_v36, %v1109_v39  ;;  %v1103_v51 = vsel %vm1100_vm2, %v1102_v58, %v1098_v26  ;;  %vm1126_vm3 = vweird.f32 %v3085_v9  ;;  %v1124_v12 = vadd.f32 %v3085_v9, %v1123_v5 }
 0x15b   : > { %v1104_v3 = vmul.f32 %v1103_v51, %v332_v48  ;;  %v1152_v63 = vsub.f32 1.0, %v1151_v25  ;;  %1490 = vrcp.f32 %v3124_v23  ;;  %v1199_v15 = vsel %vm1181_vm5, %v1089_v19, 0.0 }
 0x15c   : > { %v1489_v22 = vpop.eup %1488  ;;  %vm1115_vm4 = vcmp.eq.f32.partialorder %v1114_v41, 8.507059e+37  ;;  %vm1125_vm6 = vweird.f32 %v3029_v62  ;;  %v1131_v33 = vand.u32 2147483648, %v3029_v62  ;;  %v1200_v10 = vadd.f32 %v1199_v15, %v1198_v13 }
 0x15d   : > { %v1118_v55 = vsel %vm1115_vm4, %v1117_v7, %v1113_v0  ;;  %v1201_v31 = vsel %vm1181_vm5, %v1104_v3, 0.0  ;;  %v1153_v38 = vmul.f32 %v3115_v6, %v1152_v63  ;;  %v1136_v54 = vmul.f32 %v1489_v22, %v3106_v29  ;;  %vm3151_vm7 = vmor %vm1125_vm6, %vm1126_vm3 }
 0x15e   : > { %v1119_v36 = vmul.f32 %v1118_v55, %v335_v34  ;;  %vm3155_vm8 = vcmp.eq.f32.partialorder %v1129_v35, 8.507059e+37  ;;  %v1159_v62 = vand.u32 2147483647, %v3074_v37  ;;  %v1128_v1 = vsel %vm3151_vm7, %v3085_v9, %v1124_v12 }
 0x15f   : > { %v1154_v57 = vadd.f32 %v3115_v6, %v1153_v38  ;;  %vm1156_vm9 = vweird.f32 %v3115_v6  ;;  %v1137_v40 = vsub.f32 1.0, %v1136_v54  ;;  %v1202_v18 = vadd.f32 %v1201_v31, %v1200_v10 }
 0x160   : > { %v1132_v24 = vor.u32 1.1754944e-38, %v1131_v33  ;;  %v1161_v4 = vand.u32 2147483648, %v3074_v37  ;;  %v1146_v21 = vand.u32 2147483648, %v3106_v29  ;;  %vm1155_vm10 = vweird.f32 %v3074_v37  ;;  %v344_v56 = vpop.xlane.xlu1 %343  ;;  %v1180_v33 = vld [vmem:[#allocation7] sm:$0x1] }
 0x161   : > { %v1491_v27 = vpop.eup %1490  ;;  %v1138_v14 = vmul.f32 %v1489_v22, %v1137_v40  ;;  %vm1141_vm11 = vweird.f32 %v1489_v22  ;;  %v1144_v61 = vand.u32 2147483647, %v3106_v29  ;;  %vm3171_vm12 = vmor %vm1155_vm10, %vm1156_vm9  ;;  %vm3175_vm13 = vcmp.eq.f32.partialorder %v1159_v62, 8.507059e+37  ;;  %v347_v48 = vpop.xlane.xlu2 %346 }
 0x162   : > { %v1133_v11 = vsel %vm3155_vm8, %v1132_v24, %v1128_v1  ;;  %vm1140_vm14 = vweird.f32 %v3106_v29  ;;  %v1166_v28 = vmul.f32 %v1491_v27, %v3124_v23  ;;  %v1203_v37 = vsel %vm1181_vm5, %v1119_v36, 0.0 }
 0x163   : > { %v1134_v9 = vmul.f32 %v1133_v11, %v338_v30  ;;  %v1158_v16 = vsel %vm3171_vm12, %v3115_v6, %v1154_v57  ;;  %v1139_v49 = vadd.f32 %v1489_v22, %v1138_v14  ;;  %v1204_v42 = vadd.f32 %v1203_v37, %v1202_v18  ;;  %vm1142_vm15 = vmor %vm1140_vm14, %vm1141_vm11 }
 0x164   : > { %v1162_v59 = vor.u32 1.1754944e-38, %v1161_v4  ;;  %v1147_v17 = vor.u32 1.1754944e-38, %v1146_v21  ;;  %v1167_v32 = vsub.f32 1.0, %v1166_v28  ;;  %vm1145_vm0 = vcmp.eq.f32.partialorder %v1144_v61, 8.507059e+37 }
 0x165   : > { %v1143_v2 = vsel %vm1142_vm15, %v1489_v22, %v1139_v49  ;;  %v1174_v29 = vand.u32 2147483647, %v3124_v23  ;;  %v1176_v50 = vand.u32 2147483648, %v3124_v23  ;;  %vm1171_vm1 = vweird.f32 %v1491_v27 }
 0x166   : > { %v1163_v60 = vsel %vm3175_vm13, %v1162_v59, %v1158_v16  ;;  %v1148_v39 = vsel %vm1145_vm0, %v1147_v17, %v1143_v2  ;;  %v1168_v43 = vmul.f32 %v1491_v27, %v1167_v32  ;;  %v1205_v45 = vsel %vm1181_vm5, %v1134_v9, 0.0 }
 0x167   : > { %v1164_v52 = vmul.f32 %v1163_v60, %v344_v56  ;;  %v1149_v7 = vmul.f32 %v1148_v39, %v341_v53  ;;  %v1206_v44 = vadd.f32 %v1205_v45, %v1204_v42  ;;  %vm1170_vm2 = vweird.f32 %v3124_v23 }
 0x168   : > { %v1169_v6 = vadd.f32 %v1491_v27, %v1168_v43  ;;  %vm1172_vm3 = vmor %vm1170_vm2, %vm1171_vm1  ;;  %v1177_v58 = vor.u32 1.1754944e-38, %v1176_v50  ;;  %vm1175_vm4 = vcmp.eq.f32.partialorder %v1174_v29, 8.507059e+37  ;;  %vm1224_vm6 = vcmask 0  }
 0x169   : > { %v1207_v19 = vsel %vm1181_vm5, %v1149_v7, 0.0  ;;  %v1209_v26 = vsel %vm1181_vm5, %v1164_v52, 0.0 }
 0x16a   : > { %v1208_v5 = vadd.f32 %v1207_v19, %v1206_v44  ;;  %v1173_v47 = vsel %vm1172_vm3, %v1491_v27, %v1169_v6 }
 0x16b   : > { %v1178_v35 = vsel %vm1175_vm4, %v1177_v58, %v1173_v47 }
 0x16c   : > { %v1179_v25 = vmul.f32 %v1178_v35, %v347_v48  ;;  %v1210_v13 = vadd.f32 %v1209_v26, %v1208_v5 }
 0x16e   : > { %v1211_v0 = vsel %vm1181_vm5, %v1179_v25, 0.0 }
 0x16f   : > { %v1212_v34 = vadd.f32 %v1211_v0, %v1210_v13 }
 0x171   : > { %1213 = vadd.xlane.f32.xlu0 %v1212_v34 }
 0x1e4   : > { %v1214_v51 = vpop.xlane.xlu0 %1213 }
 0x1e5   : > { %v1215_v3 = vrot.slane %v1214_v51, 4 }
 0x1e7   : > { %v1216_v23 = vadd.f32 %v1215_v3, %v1214_v51 }
 0x1e9   : > { %v1217_v12 = vrot.slane %v1216_v23, 2 }
 0x1eb   : > { %v1218_v63 = vadd.f32 %v1217_v12, %v1216_v23 }
 0x1ed   : > { %v1219_v22 = vrot.slane %v1218_v63, 1 }
 0x1ef   : > { %v1220_v15 = vadd.f32 %v1219_v22, %v1218_v63 }
 0x1f1   : > { %1340 = vpush %v1220_v15 }
 0x222   : > { %s1341_s19 = spop %1340  ;;  %1229 = sbr.rel (%p1331_p7) target bundleno = 563 (0x233), region = 44 }
 0x223   : > { %v1222_v55 = vstv %s1341_s19 }
 0x224   : > { %v1223_v31 = vadd.f32 %v1222_v55, %v1180_v33 }
 0x226   : > { %1225 = vst.msk [vmem:[#allocation7] sm:$0x1] %vm1224_vm6, %v1223_v31 }
 0x22d   : > { %v1230_v38 = vld [vmem:[#allocation7] sm:$0x1] }
 0x22e   : > { %v1231_v54 = vmul.f32 0.004, %v1230_v38 }
 0x230   : > { %v1232_v10 = vsub.f32 2.0, %v1231_v54 }
 0x232   : > { %1233 = vst.msk [vmem:[#allocation7] sm:$0x1] %vm1224_vm6, %v1232_v10 }
 0x233 PF: > { %p1358_p11 = scmp.eq.s32.totalorder %s1662_s13, 3  ;;  %s1627_s29 = smov [#allocation7]  }
 0x234   : > { %s1240_s15 = sshll.u32 %s1627_s29, 4  ;;  %s1242_s25 = sshll.u32 %s3214_s2, 4  ;;  %s1241_s15 = int_to_ptr.vmem [resolvable:$true] %s1240_s15  ;;  %s1243_s25 = int_to_ptr.hbm [resolvable:$true] %s1242_s25 }
 0x235   : > { %1347 = dma.vmem_to_hbm [thread:$0]  (%p1358_p11), %s1241_s15, 16, %s1243_s25, [#allocation4]  }
 0x236   : > { %1605 = dma.done.wait (%p1358_p11), [#allocation4], 16  }
 0x237   : > { %1607 = vsyncadd (%p1358_p11), [#allocation4], 4294967280 }
 0x238 PF: > { %p16_p2 = scmp.ge.s32.totalorder %s1665_s14, 6   ;;  %s3274_s9 = smov %s1614_s10 }
 0x239   : > { %s3275_s10 = smov %s1618_s11  ;;  %s3276_s11 = smov %s1675_s17 }
 0x23a   : > { %s3277_s12 = smov %s1665_s14  ;;  %18 = sbr.rel (!%p16_p2) target bundleno = 6 (0x6), region = 86 }
 0x23f   :  { %1256 = vsyncpa [#allocation3], 1 }
 0x240   :  { %1258 = vsyncpa [#allocation3 + $0x1], 1 }
 0x241   :  { %1259 = vsyncpa [#allocation6], 1 }
 0x242   :  { %1261 = vsyncpa [#allocation6 + $0x1], 1 }
 0x243   :  { %1262 = vsyncpa [#allocation4], 1 }
 0x244   :  { %1264 = vsyncpa [#allocation4 + $0x1], 1 }

</bundles_post_ra>
